<compile_context>
chip_gen: v5e
topology: v5e:2x2
jax: 0.10.0
libtpu: 0.0.40
codegen_flags: <defaults>
</compile_context>

<pallas_src>
import functools

import jax
import jax.numpy as jnp
import numpy as np
from jax import lax
from jax.experimental import pallas as pl
from jax.experimental.pallas import tpu as pltpu


def _same_pad(k):
    """PyTorch Conv1d(padding='same'), stride 1, dilation 1: left = (K-1)//2, right = K-1-left."""
    left = (k - 1) // 2
    return left, k - 1 - left


# ---------------------------------------------------------------------------
# Pallas kernel: shifted-slice + FMA stencil for  conv2(x - conv1(x))
#
#   x_ref holds zero-padded rows x_pad with x_pad[:, off + m] = x[:, m],
#   off = left1 + left2, so every shifted read both convs need is a *static*
#   in-bounds slice (the zero padding realizes the 'same' boundary zeros).
# ---------------------------------------------------------------------------
def _cnn1d_stencil_kernel(w1_ref, w2_ref, x_ref, o_ref, *, K1, K2, L):
    left1, _ = _same_pad(K1)
    left2, _ = _same_pad(K2)
    L2e = L + K2 - 1                       # extended domain for x2 (covers conv2's halo)

    xp = x_ref[...]                        # (block_n, Lp_pad) f32, zero-padded columns
    rows = xp.shape[0]

    # conv1 evaluated on the extended domain e in [0, L2e), e <-> m = e - left2:
    #   conv1_ext[:, e] = sum_j w1[j] * x[m + j - left1]   (zero-extended x)
    # In padded-column coordinates this is simply xp[:, e + j].
    acc1 = w1_ref[0] * xp[:, 0:L2e]
    for j in range(1, K1):
        acc1 = acc1 + w1_ref[j] * xp[:, j:j + L2e]

    # x on the same extended domain, then x2 = x - conv1(x), forced to 0 outside [0, L)
    # (exactly the zero padding conv2 sees in PyTorch).
    x_ext = xp[:, left1:left1 + L2e]
    e_idx = lax.broadcasted_iota(jnp.int32, (rows, L2e), 1)
    valid = (e_idx >= left2) & (e_idx < left2 + L)
    x2_ext = jnp.where(valid, x_ext - acc1, 0.0)

    # conv2:  out[:, n] = sum_i w2[i] * x2_ext[:, n + i]
    acc2 = w2_ref[0] * x2_ext[:, 0:L]
    for i in range(1, K2):
        acc2 = acc2 + w2_ref[i] * x2_ext[:, i:i + L]

    o_ref[...] = acc2.astype(o_ref.dtype)


def cnn1d_model_pallas(x_ncl, w1, w2, *, block_n_max=256):
    """x_ncl: (N, 1, L) float; w1: (K1,), w2: (K2,) taps.  Returns (N, 1, L) float32."""
    N, C, L = x_ncl.shape
    assert C == 1, "cnn1d_model uses a single channel"
    K1 = int(w1.shape[0])
    K2 = int(w2.shape[0])
    left1, _ = _same_pad(K1)
    left2, _ = _same_pad(K2)

    # One zero-padded copy of the sequence covers the 'same' padding of both convs.
    off = left1 + left2
    Lp = L + (K1 - 1) + (K2 - 1)
    Lp_pad = ((Lp + 127) // 128) * 128     # lane-align the input block

    # Pad batch rows to the f32 sublane tile (8) -> unmasked stores; tile rows for the grid.
    SUBLANE = 8
    n_pad = ((N + SUBLANE - 1) // SUBLANE) * SUBLANE
    block_n = min(n_pad, block_n_max)
    n_pad = ((n_pad + block_n - 1) // block_n) * block_n

    x2d = x_ncl.reshape(N, L).astype(jnp.float32)
    xp = jnp.zeros((n_pad, Lp_pad), jnp.float32)
    xp = xp.at[:N, off:off + L].set(x2d)

    kernel = functools.partial(_cnn1d_stencil_kernel, K1=K1, K2=K2, L=L)

    out = pl.pallas_call(
        kernel,
        out_shape=jax.ShapeDtypeStruct((n_pad, L), jnp.float32),
        grid_spec=pltpu.PrefetchScalarGridSpec(
            num_scalar_prefetch=0,
            grid=(n_pad // block_n,),                               # row tiles (batch)
            in_specs=[
                pl.BlockSpec(memory_space=pltpu.MemorySpace.SMEM),  # w1 taps (K1 f32)
                pl.BlockSpec(memory_space=pltpu.MemorySpace.SMEM),  # w2 taps (K2 f32)
                pl.BlockSpec((block_n, Lp_pad), lambda i: (i, 0)),  # padded input rows
            ],
            out_specs=pl.BlockSpec((block_n, L), lambda i: (i, 0)),
        ),
        compiler_params=pltpu.CompilerParams(
            dimension_semantics=("parallel",)),                     # v7x: 2 TCs split batch
    )(w1.astype(jnp.float32), w2.astype(jnp.float32), xp)

    return out[:N].reshape(N, 1, L)


# ---------------------------------------------------------------------------
# Pure-JAX reference (lax conv is cross-correlation, same as PyTorch Conv1d)
# ---------------------------------------------------------------------------
def _conv_same_ref(x_ncl, w):
    K = w.shape[0]
    left, right = _same_pad(K)
    return lax.conv_general_dilated(
        x_ncl, w.reshape(1, 1, K),
        window_strides=(1,), padding=[(left, right)],
        dimension_numbers=("NCH", "OIH", "NCH"))


def cnn1d_model_ref(x_ncl, w1, w2):
    x1 = _conv_same_ref(x_ncl, w1)
    x2 = x_ncl - x1
    return _conv_same_ref(x2, w2)


if __name__ == "__main__":
    K1, K2 = 60, 10          # kernel_size_1, kernel_size_2 from the module
    N, L = 2, 128            # small batch, sequence length

    key = jax.random.PRNGKey(0)
    kx, kw1, kw2 = jax.random.split(key, 3)

    # Deterministic init mimicking PyTorch Conv1d default: U(-1/sqrt(fan_in), +1/sqrt(fan_in))
    b1 = 1.0 / np.sqrt(K1)
    b2 = 1.0 / np.sqrt(K2)
    w1 = jax.random.uniform(kw1, (K1,), jnp.float32, minval=-b1, maxval=b1)
    w2 = jax.random.uniform(kw2, (K2,), jnp.float32, minval=-b2, maxval=b2)

    x = jax.random.normal(kx, (N, 1, L), jnp.float32)

    fwd = jax.jit(cnn1d_model_pallas)
    out = jax.block_until_ready(fwd(x, w1, w2))
    ref = jax.block_until_ready(cnn1d_model_ref(x, w1, w2))

    np.testing.assert_allclose(np.asarray(out), np.asarray(ref),
                               rtol=1e-5, atol=1e-5)
    print("KERNEL_OK")
</pallas_src>

<mosaic_0001>
module attributes {stable_mosaic.version = 11 : i64} {
  func.func @_cnn1d_stencil_kernel(%arg0: i32, %arg1: memref<60xf32, #tpu.memory_space<smem>>, %arg2: memref<10xf32, #tpu.memory_space<smem>>, %arg3: memref<8x256xf32, #tpu.memory_space<vmem>>, %arg4: memref<8x128xf32, #tpu.memory_space<vmem>>) attributes {dimension_semantics = [#tpu.dimension_semantics<parallel>], iteration_bounds = array<i64: 1>, scalar_prefetch = 0 : i64, scratch_operands = 0 : i64, tpu.core_type = #tpu.core_type<tc>, window_params = [{transform_indices = @transform_0, window_bounds = array<i64: 60>}, {transform_indices = @transform_1, window_bounds = array<i64: 10>}, {transform_indices = @transform_2, window_bounds = array<i64: 8, 256>}, {transform_indices = @transform_3, window_bounds = array<i64: 8, 128>}]} {
    %c0 = arith.constant 0 : index
    %c0_0 = arith.constant 0 : index
    %0 = vector.load %arg3[%c0, %c0_0] : memref<8x256xf32, #tpu.memory_space<vmem>>, vector<8x256xf32>
    %c0_1 = arith.constant 0 : index
    %1 = memref.load %arg1[%c0_1] : memref<60xf32, #tpu.memory_space<smem>>
    %2 = vector.extract_strided_slice %0 {offsets = [0, 0], sizes = [8, 137], strides = [1, 1]} : vector<8x256xf32> to vector<8x137xf32>
    %3 = vector.broadcast %1 : f32 to vector<8x137xf32>
    %4 = arith.mulf %3, %2 : vector<8x137xf32>
    %c1 = arith.constant 1 : index
    %5 = memref.load %arg1[%c1] : memref<60xf32, #tpu.memory_space<smem>>
    %6 = vector.extract_strided_slice %0 {offsets = [0, 1], sizes = [8, 137], strides = [1, 1]} : vector<8x256xf32> to vector<8x137xf32>
    %7 = vector.broadcast %5 : f32 to vector<8x137xf32>
    %8 = arith.mulf %7, %6 : vector<8x137xf32>
    %9 = arith.addf %4, %8 : vector<8x137xf32>
    %c2 = arith.constant 2 : index
    %10 = memref.load %arg1[%c2] : memref<60xf32, #tpu.memory_space<smem>>
    %11 = vector.extract_strided_slice %0 {offsets = [0, 2], sizes = [8, 137], strides = [1, 1]} : vector<8x256xf32> to vector<8x137xf32>
    %12 = vector.broadcast %10 : f32 to vector<8x137xf32>
    %13 = arith.mulf %12, %11 : vector<8x137xf32>
    %14 = arith.addf %9, %13 : vector<8x137xf32>
    %c3 = arith.constant 3 : index
    %15 = memref.load %arg1[%c3] : memref<60xf32, #tpu.memory_space<smem>>
    %16 = vector.extract_strided_slice %0 {offsets = [0, 3], sizes = [8, 137], strides = [1, 1]} : vector<8x256xf32> to vector<8x137xf32>
    %17 = vector.broadcast %15 : f32 to vector<8x137xf32>
    %18 = arith.mulf %17, %16 : vector<8x137xf32>
    %19 = arith.addf %14, %18 : vector<8x137xf32>
    %c4 = arith.constant 4 : index
    %20 = memref.load %arg1[%c4] : memref<60xf32, #tpu.memory_space<smem>>
    %21 = vector.extract_strided_slice %0 {offsets = [0, 4], sizes = [8, 137], strides = [1, 1]} : vector<8x256xf32> to vector<8x137xf32>
    %22 = vector.broadcast %20 : f32 to vector<8x137xf32>
    %23 = arith.mulf %22, %21 : vector<8x137xf32>
    %24 = arith.addf %19, %23 : vector<8x137xf32>
    %c5 = arith.constant 5 : index
    %25 = memref.load %arg1[%c5] : memref<60xf32, #tpu.memory_space<smem>>
    %26 = vector.extract_strided_slice %0 {offsets = [0, 5], sizes = [8, 137], strides = [1, 1]} : vector<8x256xf32> to vector<8x137xf32>
    %27 = vector.broadcast %25 : f32 to vector<8x137xf32>
    %28 = arith.mulf %27, %26 : vector<8x137xf32>
    %29 = arith.addf %24, %28 : vector<8x137xf32>
    %c6 = arith.constant 6 : index
    %30 = memref.load %arg1[%c6] : memref<60xf32, #tpu.memory_space<smem>>
    %31 = vector.extract_strided_slice %0 {offsets = [0, 6], sizes = [8, 137], strides = [1, 1]} : vector<8x256xf32> to vector<8x137xf32>
    %32 = vector.broadcast %30 : f32 to vector<8x137xf32>
    %33 = arith.mulf %32, %31 : vector<8x137xf32>
    %34 = arith.addf %29, %33 : vector<8x137xf32>
    %c7 = arith.constant 7 : index
    %35 = memref.load %arg1[%c7] : memref<60xf32, #tpu.memory_space<smem>>
    %36 = vector.extract_strided_slice %0 {offsets = [0, 7], sizes = [8, 137], strides = [1, 1]} : vector<8x256xf32> to vector<8x137xf32>
    %37 = vector.broadcast %35 : f32 to vector<8x137xf32>
    %38 = arith.mulf %37, %36 : vector<8x137xf32>
    %39 = arith.addf %34, %38 : vector<8x137xf32>
    %c8 = arith.constant 8 : index
    %40 = memref.load %arg1[%c8] : memref<60xf32, #tpu.memory_space<smem>>
    %41 = vector.extract_strided_slice %0 {offsets = [0, 8], sizes = [8, 137], strides = [1, 1]} : vector<8x256xf32> to vector<8x137xf32>
    %42 = vector.broadcast %40 : f32 to vector<8x137xf32>
    %43 = arith.mulf %42, %41 : vector<8x137xf32>
    %44 = arith.addf %39, %43 : vector<8x137xf32>
    %c9 = arith.constant 9 : index
    %45 = memref.load %arg1[%c9] : memref<60xf32, #tpu.memory_space<smem>>
    %46 = vector.extract_strided_slice %0 {offsets = [0, 9], sizes = [8, 137], strides = [1, 1]} : vector<8x256xf32> to vector<8x137xf32>
    %47 = vector.broadcast %45 : f32 to vector<8x137xf32>
    %48 = arith.mulf %47, %46 : vector<8x137xf32>
    %49 = arith.addf %44, %48 : vector<8x137xf32>
    %c10 = arith.constant 10 : index
    %50 = memref.load %arg1[%c10] : memref<60xf32, #tpu.memory_space<smem>>
    %51 = vector.extract_strided_slice %0 {offsets = [0, 10], sizes = [8, 137], strides = [1, 1]} : vector<8x256xf32> to vector<8x137xf32>
    %52 = vector.broadcast %50 : f32 to vector<8x137xf32>
    %53 = arith.mulf %52, %51 : vector<8x137xf32>
    %54 = arith.addf %49, %53 : vector<8x137xf32>
    %c11 = arith.constant 11 : index
    %55 = memref.load %arg1[%c11] : memref<60xf32, #tpu.memory_space<smem>>
    %56 = vector.extract_strided_slice %0 {offsets = [0, 11], sizes = [8, 137], strides = [1, 1]} : vector<8x256xf32> to vector<8x137xf32>
    %57 = vector.broadcast %55 : f32 to vector<8x137xf32>
    %58 = arith.mulf %57, %56 : vector<8x137xf32>
    %59 = arith.addf %54, %58 : vector<8x137xf32>
    %c12 = arith.constant 12 : index
    %60 = memref.load %arg1[%c12] : memref<60xf32, #tpu.memory_space<smem>>
    %61 = vector.extract_strided_slice %0 {offsets = [0, 12], sizes = [8, 137], strides = [1, 1]} : vector<8x256xf32> to vector<8x137xf32>
    %62 = vector.broadcast %60 : f32 to vector<8x137xf32>
    %63 = arith.mulf %62, %61 : vector<8x137xf32>
    %64 = arith.addf %59, %63 : vector<8x137xf32>
    %c13 = arith.constant 13 : index
    %65 = memref.load %arg1[%c13] : memref<60xf32, #tpu.memory_space<smem>>
    %66 = vector.extract_strided_slice %0 {offsets = [0, 13], sizes = [8, 137], strides = [1, 1]} : vector<8x256xf32> to vector<8x137xf32>
    %67 = vector.broadcast %65 : f32 to vector<8x137xf32>
    %68 = arith.mulf %67, %66 : vector<8x137xf32>
    %69 = arith.addf %64, %68 : vector<8x137xf32>
    %c14 = arith.constant 14 : index
    %70 = memref.load %arg1[%c14] : memref<60xf32, #tpu.memory_space<smem>>
    %71 = vector.extract_strided_slice %0 {offsets = [0, 14], sizes = [8, 137], strides = [1, 1]} : vector<8x256xf32> to vector<8x137xf32>
    %72 = vector.broadcast %70 : f32 to vector<8x137xf32>
    %73 = arith.mulf %72, %71 : vector<8x137xf32>
    %74 = arith.addf %69, %73 : vector<8x137xf32>
    %c15 = arith.constant 15 : index
    %75 = memref.load %arg1[%c15] : memref<60xf32, #tpu.memory_space<smem>>
    %76 = vector.extract_strided_slice %0 {offsets = [0, 15], sizes = [8, 137], strides = [1, 1]} : vector<8x256xf32> to vector<8x137xf32>
    %77 = vector.broadcast %75 : f32 to vector<8x137xf32>
    %78 = arith.mulf %77, %76 : vector<8x137xf32>
    %79 = arith.addf %74, %78 : vector<8x137xf32>
    %c16 = arith.constant 16 : index
    %80 = memref.load %arg1[%c16] : memref<60xf32, #tpu.memory_space<smem>>
    %81 = vector.extract_strided_slice %0 {offsets = [0, 16], sizes = [8, 137], strides = [1, 1]} : vector<8x256xf32> to vector<8x137xf32>
    %82 = vector.broadcast %80 : f32 to vector<8x137xf32>
    %83 = arith.mulf %82, %81 : vector<8x137xf32>
    %84 = arith.addf %79, %83 : vector<8x137xf32>
    %c17 = arith.constant 17 : index
    %85 = memref.load %arg1[%c17] : memref<60xf32, #tpu.memory_space<smem>>
    %86 = vector.extract_strided_slice %0 {offsets = [0, 17], sizes = [8, 137], strides = [1, 1]} : vector<8x256xf32> to vector<8x137xf32>
    %87 = vector.broadcast %85 : f32 to vector<8x137xf32>
    %88 = arith.mulf %87, %86 : vector<8x137xf32>
    %89 = arith.addf %84, %88 : vector<8x137xf32>
    %c18 = arith.constant 18 : index
    %90 = memref.load %arg1[%c18] : memref<60xf32, #tpu.memory_space<smem>>
    %91 = vector.extract_strided_slice %0 {offsets = [0, 18], sizes = [8, 137], strides = [1, 1]} : vector<8x256xf32> to vector<8x137xf32>
    %92 = vector.broadcast %90 : f32 to vector<8x137xf32>
    %93 = arith.mulf %92, %91 : vector<8x137xf32>
    %94 = arith.addf %89, %93 : vector<8x137xf32>
    %c19 = arith.constant 19 : index
    %95 = memref.load %arg1[%c19] : memref<60xf32, #tpu.memory_space<smem>>
    %96 = vector.extract_strided_slice %0 {offsets = [0, 19], sizes = [8, 137], strides = [1, 1]} : vector<8x256xf32> to vector<8x137xf32>
    %97 = vector.broadcast %95 : f32 to vector<8x137xf32>
    %98 = arith.mulf %97, %96 : vector<8x137xf32>
    %99 = arith.addf %94, %98 : vector<8x137xf32>
    %c20 = arith.constant 20 : index
    %100 = memref.load %arg1[%c20] : memref<60xf32, #tpu.memory_space<smem>>
    %101 = vector.extract_strided_slice %0 {offsets = [0, 20], sizes = [8, 137], strides = [1, 1]} : vector<8x256xf32> to vector<8x137xf32>
    %102 = vector.broadcast %100 : f32 to vector<8x137xf32>
    %103 = arith.mulf %102, %101 : vector<8x137xf32>
    %104 = arith.addf %99, %103 : vector<8x137xf32>
    %c21 = arith.constant 21 : index
    %105 = memref.load %arg1[%c21] : memref<60xf32, #tpu.memory_space<smem>>
    %106 = vector.extract_strided_slice %0 {offsets = [0, 21], sizes = [8, 137], strides = [1, 1]} : vector<8x256xf32> to vector<8x137xf32>
    %107 = vector.broadcast %105 : f32 to vector<8x137xf32>
    %108 = arith.mulf %107, %106 : vector<8x137xf32>
    %109 = arith.addf %104, %108 : vector<8x137xf32>
    %c22 = arith.constant 22 : index
    %110 = memref.load %arg1[%c22] : memref<60xf32, #tpu.memory_space<smem>>
    %111 = vector.extract_strided_slice %0 {offsets = [0, 22], sizes = [8, 137], strides = [1, 1]} : vector<8x256xf32> to vector<8x137xf32>
    %112 = vector.broadcast %110 : f32 to vector<8x137xf32>
    %113 = arith.mulf %112, %111 : vector<8x137xf32>
    %114 = arith.addf %109, %113 : vector<8x137xf32>
    %c23 = arith.constant 23 : index
    %115 = memref.load %arg1[%c23] : memref<60xf32, #tpu.memory_space<smem>>
    %116 = vector.extract_strided_slice %0 {offsets = [0, 23], sizes = [8, 137], strides = [1, 1]} : vector<8x256xf32> to vector<8x137xf32>
    %117 = vector.broadcast %115 : f32 to vector<8x137xf32>
    %118 = arith.mulf %117, %116 : vector<8x137xf32>
    %119 = arith.addf %114, %118 : vector<8x137xf32>
    %c24 = arith.constant 24 : index
    %120 = memref.load %arg1[%c24] : memref<60xf32, #tpu.memory_space<smem>>
    %121 = vector.extract_strided_slice %0 {offsets = [0, 24], sizes = [8, 137], strides = [1, 1]} : vector<8x256xf32> to vector<8x137xf32>
    %122 = vector.broadcast %120 : f32 to vector<8x137xf32>
    %123 = arith.mulf %122, %121 : vector<8x137xf32>
    %124 = arith.addf %119, %123 : vector<8x137xf32>
    %c25 = arith.constant 25 : index
    %125 = memref.load %arg1[%c25] : memref<60xf32, #tpu.memory_space<smem>>
    %126 = vector.extract_strided_slice %0 {offsets = [0, 25], sizes = [8, 137], strides = [1, 1]} : vector<8x256xf32> to vector<8x137xf32>
    %127 = vector.broadcast %125 : f32 to vector<8x137xf32>
    %128 = arith.mulf %127, %126 : vector<8x137xf32>
    %129 = arith.addf %124, %128 : vector<8x137xf32>
    %c26 = arith.constant 26 : index
    %130 = memref.load %arg1[%c26] : memref<60xf32, #tpu.memory_space<smem>>
    %131 = vector.extract_strided_slice %0 {offsets = [0, 26], sizes = [8, 137], strides = [1, 1]} : vector<8x256xf32> to vector<8x137xf32>
    %132 = vector.broadcast %130 : f32 to vector<8x137xf32>
    %133 = arith.mulf %132, %131 : vector<8x137xf32>
    %134 = arith.addf %129, %133 : vector<8x137xf32>
    %c27 = arith.constant 27 : index
    %135 = memref.load %arg1[%c27] : memref<60xf32, #tpu.memory_space<smem>>
    %136 = vector.extract_strided_slice %0 {offsets = [0, 27], sizes = [8, 137], strides = [1, 1]} : vector<8x256xf32> to vector<8x137xf32>
    %137 = vector.broadcast %135 : f32 to vector<8x137xf32>
    %138 = arith.mulf %137, %136 : vector<8x137xf32>
    %139 = arith.addf %134, %138 : vector<8x137xf32>
    %c28 = arith.constant 28 : index
    %140 = memref.load %arg1[%c28] : memref<60xf32, #tpu.memory_space<smem>>
    %141 = vector.extract_strided_slice %0 {offsets = [0, 28], sizes = [8, 137], strides = [1, 1]} : vector<8x256xf32> to vector<8x137xf32>
    %142 = vector.broadcast %140 : f32 to vector<8x137xf32>
    %143 = arith.mulf %142, %141 : vector<8x137xf32>
    %144 = arith.addf %139, %143 : vector<8x137xf32>
    %c29 = arith.constant 29 : index
    %145 = memref.load %arg1[%c29] : memref<60xf32, #tpu.memory_space<smem>>
    %146 = vector.extract_strided_slice %0 {offsets = [0, 29], sizes = [8, 137], strides = [1, 1]} : vector<8x256xf32> to vector<8x137xf32>
    %147 = vector.broadcast %145 : f32 to vector<8x137xf32>
    %148 = arith.mulf %147, %146 : vector<8x137xf32>
    %149 = arith.addf %144, %148 : vector<8x137xf32>
    %c30 = arith.constant 30 : index
    %150 = memref.load %arg1[%c30] : memref<60xf32, #tpu.memory_space<smem>>
    %151 = vector.extract_strided_slice %0 {offsets = [0, 30], sizes = [8, 137], strides = [1, 1]} : vector<8x256xf32> to vector<8x137xf32>
    %152 = vector.broadcast %150 : f32 to vector<8x137xf32>
    %153 = arith.mulf %152, %151 : vector<8x137xf32>
    %154 = arith.addf %149, %153 : vector<8x137xf32>
    %c31 = arith.constant 31 : index
    %155 = memref.load %arg1[%c31] : memref<60xf32, #tpu.memory_space<smem>>
    %156 = vector.extract_strided_slice %0 {offsets = [0, 31], sizes = [8, 137], strides = [1, 1]} : vector<8x256xf32> to vector<8x137xf32>
    %157 = vector.broadcast %155 : f32 to vector<8x137xf32>
    %158 = arith.mulf %157, %156 : vector<8x137xf32>
    %159 = arith.addf %154, %158 : vector<8x137xf32>
    %c32 = arith.constant 32 : index
    %160 = memref.load %arg1[%c32] : memref<60xf32, #tpu.memory_space<smem>>
    %161 = vector.extract_strided_slice %0 {offsets = [0, 32], sizes = [8, 137], strides = [1, 1]} : vector<8x256xf32> to vector<8x137xf32>
    %162 = vector.broadcast %160 : f32 to vector<8x137xf32>
    %163 = arith.mulf %162, %161 : vector<8x137xf32>
    %164 = arith.addf %159, %163 : vector<8x137xf32>
    %c33 = arith.constant 33 : index
    %165 = memref.load %arg1[%c33] : memref<60xf32, #tpu.memory_space<smem>>
    %166 = vector.extract_strided_slice %0 {offsets = [0, 33], sizes = [8, 137], strides = [1, 1]} : vector<8x256xf32> to vector<8x137xf32>
    %167 = vector.broadcast %165 : f32 to vector<8x137xf32>
    %168 = arith.mulf %167, %166 : vector<8x137xf32>
    %169 = arith.addf %164, %168 : vector<8x137xf32>
    %c34 = arith.constant 34 : index
    %170 = memref.load %arg1[%c34] : memref<60xf32, #tpu.memory_space<smem>>
    %171 = vector.extract_strided_slice %0 {offsets = [0, 34], sizes = [8, 137], strides = [1, 1]} : vector<8x256xf32> to vector<8x137xf32>
    %172 = vector.broadcast %170 : f32 to vector<8x137xf32>
    %173 = arith.mulf %172, %171 : vector<8x137xf32>
    %174 = arith.addf %169, %173 : vector<8x137xf32>
    %c35 = arith.constant 35 : index
    %175 = memref.load %arg1[%c35] : memref<60xf32, #tpu.memory_space<smem>>
    %176 = vector.extract_strided_slice %0 {offsets = [0, 35], sizes = [8, 137], strides = [1, 1]} : vector<8x256xf32> to vector<8x137xf32>
    %177 = vector.broadcast %175 : f32 to vector<8x137xf32>
    %178 = arith.mulf %177, %176 : vector<8x137xf32>
    %179 = arith.addf %174, %178 : vector<8x137xf32>
    %c36 = arith.constant 36 : index
    %180 = memref.load %arg1[%c36] : memref<60xf32, #tpu.memory_space<smem>>
    %181 = vector.extract_strided_slice %0 {offsets = [0, 36], sizes = [8, 137], strides = [1, 1]} : vector<8x256xf32> to vector<8x137xf32>
    %182 = vector.broadcast %180 : f32 to vector<8x137xf32>
    %183 = arith.mulf %182, %181 : vector<8x137xf32>
    %184 = arith.addf %179, %183 : vector<8x137xf32>
    %c37 = arith.constant 37 : index
    %185 = memref.load %arg1[%c37] : memref<60xf32, #tpu.memory_space<smem>>
    %186 = vector.extract_strided_slice %0 {offsets = [0, 37], sizes = [8, 137], strides = [1, 1]} : vector<8x256xf32> to vector<8x137xf32>
    %187 = vector.broadcast %185 : f32 to vector<8x137xf32>
    %188 = arith.mulf %187, %186 : vector<8x137xf32>
    %189 = arith.addf %184, %188 : vector<8x137xf32>
    %c38 = arith.constant 38 : index
    %190 = memref.load %arg1[%c38] : memref<60xf32, #tpu.memory_space<smem>>
    %191 = vector.extract_strided_slice %0 {offsets = [0, 38], sizes = [8, 137], strides = [1, 1]} : vector<8x256xf32> to vector<8x137xf32>
    %192 = vector.broadcast %190 : f32 to vector<8x137xf32>
    %193 = arith.mulf %192, %191 : vector<8x137xf32>
    %194 = arith.addf %189, %193 : vector<8x137xf32>
    %c39 = arith.constant 39 : index
    %195 = memref.load %arg1[%c39] : memref<60xf32, #tpu.memory_space<smem>>
    %196 = vector.extract_strided_slice %0 {offsets = [0, 39], sizes = [8, 137], strides = [1, 1]} : vector<8x256xf32> to vector<8x137xf32>
    %197 = vector.broadcast %195 : f32 to vector<8x137xf32>
    %198 = arith.mulf %197, %196 : vector<8x137xf32>
    %199 = arith.addf %194, %198 : vector<8x137xf32>
    %c40 = arith.constant 40 : index
    %200 = memref.load %arg1[%c40] : memref<60xf32, #tpu.memory_space<smem>>
    %201 = vector.extract_strided_slice %0 {offsets = [0, 40], sizes = [8, 137], strides = [1, 1]} : vector<8x256xf32> to vector<8x137xf32>
    %202 = vector.broadcast %200 : f32 to vector<8x137xf32>
    %203 = arith.mulf %202, %201 : vector<8x137xf32>
    %204 = arith.addf %199, %203 : vector<8x137xf32>
    %c41 = arith.constant 41 : index
    %205 = memref.load %arg1[%c41] : memref<60xf32, #tpu.memory_space<smem>>
    %206 = vector.extract_strided_slice %0 {offsets = [0, 41], sizes = [8, 137], strides = [1, 1]} : vector<8x256xf32> to vector<8x137xf32>
    %207 = vector.broadcast %205 : f32 to vector<8x137xf32>
    %208 = arith.mulf %207, %206 : vector<8x137xf32>
    %209 = arith.addf %204, %208 : vector<8x137xf32>
    %c42 = arith.constant 42 : index
    %210 = memref.load %arg1[%c42] : memref<60xf32, #tpu.memory_space<smem>>
    %211 = vector.extract_strided_slice %0 {offsets = [0, 42], sizes = [8, 137], strides = [1, 1]} : vector<8x256xf32> to vector<8x137xf32>
    %212 = vector.broadcast %210 : f32 to vector<8x137xf32>
    %213 = arith.mulf %212, %211 : vector<8x137xf32>
    %214 = arith.addf %209, %213 : vector<8x137xf32>
    %c43 = arith.constant 43 : index
    %215 = memref.load %arg1[%c43] : memref<60xf32, #tpu.memory_space<smem>>
    %216 = vector.extract_strided_slice %0 {offsets = [0, 43], sizes = [8, 137], strides = [1, 1]} : vector<8x256xf32> to vector<8x137xf32>
    %217 = vector.broadcast %215 : f32 to vector<8x137xf32>
    %218 = arith.mulf %217, %216 : vector<8x137xf32>
    %219 = arith.addf %214, %218 : vector<8x137xf32>
    %c44 = arith.constant 44 : index
    %220 = memref.load %arg1[%c44] : memref<60xf32, #tpu.memory_space<smem>>
    %221 = vector.extract_strided_slice %0 {offsets = [0, 44], sizes = [8, 137], strides = [1, 1]} : vector<8x256xf32> to vector<8x137xf32>
    %222 = vector.broadcast %220 : f32 to vector<8x137xf32>
    %223 = arith.mulf %222, %221 : vector<8x137xf32>
    %224 = arith.addf %219, %223 : vector<8x137xf32>
    %c45 = arith.constant 45 : index
    %225 = memref.load %arg1[%c45] : memref<60xf32, #tpu.memory_space<smem>>
    %226 = vector.extract_strided_slice %0 {offsets = [0, 45], sizes = [8, 137], strides = [1, 1]} : vector<8x256xf32> to vector<8x137xf32>
    %227 = vector.broadcast %225 : f32 to vector<8x137xf32>
    %228 = arith.mulf %227, %226 : vector<8x137xf32>
    %229 = arith.addf %224, %228 : vector<8x137xf32>
    %c46 = arith.constant 46 : index
    %230 = memref.load %arg1[%c46] : memref<60xf32, #tpu.memory_space<smem>>
    %231 = vector.extract_strided_slice %0 {offsets = [0, 46], sizes = [8, 137], strides = [1, 1]} : vector<8x256xf32> to vector<8x137xf32>
    %232 = vector.broadcast %230 : f32 to vector<8x137xf32>
    %233 = arith.mulf %232, %231 : vector<8x137xf32>
    %234 = arith.addf %229, %233 : vector<8x137xf32>
    %c47 = arith.constant 47 : index
    %235 = memref.load %arg1[%c47] : memref<60xf32, #tpu.memory_space<smem>>
    %236 = vector.extract_strided_slice %0 {offsets = [0, 47], sizes = [8, 137], strides = [1, 1]} : vector<8x256xf32> to vector<8x137xf32>
    %237 = vector.broadcast %235 : f32 to vector<8x137xf32>
    %238 = arith.mulf %237, %236 : vector<8x137xf32>
    %239 = arith.addf %234, %238 : vector<8x137xf32>
    %c48 = arith.constant 48 : index
    %240 = memref.load %arg1[%c48] : memref<60xf32, #tpu.memory_space<smem>>
    %241 = vector.extract_strided_slice %0 {offsets = [0, 48], sizes = [8, 137], strides = [1, 1]} : vector<8x256xf32> to vector<8x137xf32>
    %242 = vector.broadcast %240 : f32 to vector<8x137xf32>
    %243 = arith.mulf %242, %241 : vector<8x137xf32>
    %244 = arith.addf %239, %243 : vector<8x137xf32>
    %c49 = arith.constant 49 : index
    %245 = memref.load %arg1[%c49] : memref<60xf32, #tpu.memory_space<smem>>
    %246 = vector.extract_strided_slice %0 {offsets = [0, 49], sizes = [8, 137], strides = [1, 1]} : vector<8x256xf32> to vector<8x137xf32>
    %247 = vector.broadcast %245 : f32 to vector<8x137xf32>
    %248 = arith.mulf %247, %246 : vector<8x137xf32>
    %249 = arith.addf %244, %248 : vector<8x137xf32>
    %c50 = arith.constant 50 : index
    %250 = memref.load %arg1[%c50] : memref<60xf32, #tpu.memory_space<smem>>
    %251 = vector.extract_strided_slice %0 {offsets = [0, 50], sizes = [8, 137], strides = [1, 1]} : vector<8x256xf32> to vector<8x137xf32>
    %252 = vector.broadcast %250 : f32 to vector<8x137xf32>
    %253 = arith.mulf %252, %251 : vector<8x137xf32>
    %254 = arith.addf %249, %253 : vector<8x137xf32>
    %c51 = arith.constant 51 : index
    %255 = memref.load %arg1[%c51] : memref<60xf32, #tpu.memory_space<smem>>
    %256 = vector.extract_strided_slice %0 {offsets = [0, 51], sizes = [8, 137], strides = [1, 1]} : vector<8x256xf32> to vector<8x137xf32>
    %257 = vector.broadcast %255 : f32 to vector<8x137xf32>
    %258 = arith.mulf %257, %256 : vector<8x137xf32>
    %259 = arith.addf %254, %258 : vector<8x137xf32>
    %c52 = arith.constant 52 : index
    %260 = memref.load %arg1[%c52] : memref<60xf32, #tpu.memory_space<smem>>
    %261 = vector.extract_strided_slice %0 {offsets = [0, 52], sizes = [8, 137], strides = [1, 1]} : vector<8x256xf32> to vector<8x137xf32>
    %262 = vector.broadcast %260 : f32 to vector<8x137xf32>
    %263 = arith.mulf %262, %261 : vector<8x137xf32>
    %264 = arith.addf %259, %263 : vector<8x137xf32>
    %c53 = arith.constant 53 : index
    %265 = memref.load %arg1[%c53] : memref<60xf32, #tpu.memory_space<smem>>
    %266 = vector.extract_strided_slice %0 {offsets = [0, 53], sizes = [8, 137], strides = [1, 1]} : vector<8x256xf32> to vector<8x137xf32>
    %267 = vector.broadcast %265 : f32 to vector<8x137xf32>
    %268 = arith.mulf %267, %266 : vector<8x137xf32>
    %269 = arith.addf %264, %268 : vector<8x137xf32>
    %c54 = arith.constant 54 : index
    %270 = memref.load %arg1[%c54] : memref<60xf32, #tpu.memory_space<smem>>
    %271 = vector.extract_strided_slice %0 {offsets = [0, 54], sizes = [8, 137], strides = [1, 1]} : vector<8x256xf32> to vector<8x137xf32>
    %272 = vector.broadcast %270 : f32 to vector<8x137xf32>
    %273 = arith.mulf %272, %271 : vector<8x137xf32>
    %274 = arith.addf %269, %273 : vector<8x137xf32>
    %c55 = arith.constant 55 : index
    %275 = memref.load %arg1[%c55] : memref<60xf32, #tpu.memory_space<smem>>
    %276 = vector.extract_strided_slice %0 {offsets = [0, 55], sizes = [8, 137], strides = [1, 1]} : vector<8x256xf32> to vector<8x137xf32>
    %277 = vector.broadcast %275 : f32 to vector<8x137xf32>
    %278 = arith.mulf %277, %276 : vector<8x137xf32>
    %279 = arith.addf %274, %278 : vector<8x137xf32>
    %c56 = arith.constant 56 : index
    %280 = memref.load %arg1[%c56] : memref<60xf32, #tpu.memory_space<smem>>
    %281 = vector.extract_strided_slice %0 {offsets = [0, 56], sizes = [8, 137], strides = [1, 1]} : vector<8x256xf32> to vector<8x137xf32>
    %282 = vector.broadcast %280 : f32 to vector<8x137xf32>
    %283 = arith.mulf %282, %281 : vector<8x137xf32>
    %284 = arith.addf %279, %283 : vector<8x137xf32>
    %c57 = arith.constant 57 : index
    %285 = memref.load %arg1[%c57] : memref<60xf32, #tpu.memory_space<smem>>
    %286 = vector.extract_strided_slice %0 {offsets = [0, 57], sizes = [8, 137], strides = [1, 1]} : vector<8x256xf32> to vector<8x137xf32>
    %287 = vector.broadcast %285 : f32 to vector<8x137xf32>
    %288 = arith.mulf %287, %286 : vector<8x137xf32>
    %289 = arith.addf %284, %288 : vector<8x137xf32>
    %c58 = arith.constant 58 : index
    %290 = memref.load %arg1[%c58] : memref<60xf32, #tpu.memory_space<smem>>
    %291 = vector.extract_strided_slice %0 {offsets = [0, 58], sizes = [8, 137], strides = [1, 1]} : vector<8x256xf32> to vector<8x137xf32>
    %292 = vector.broadcast %290 : f32 to vector<8x137xf32>
    %293 = arith.mulf %292, %291 : vector<8x137xf32>
    %294 = arith.addf %289, %293 : vector<8x137xf32>
    %c59 = arith.constant 59 : index
    %295 = memref.load %arg1[%c59] : memref<60xf32, #tpu.memory_space<smem>>
    %296 = vector.extract_strided_slice %0 {offsets = [0, 59], sizes = [8, 137], strides = [1, 1]} : vector<8x256xf32> to vector<8x137xf32>
    %297 = vector.broadcast %295 : f32 to vector<8x137xf32>
    %298 = arith.mulf %297, %296 : vector<8x137xf32>
    %299 = arith.addf %294, %298 : vector<8x137xf32>
    %300 = vector.extract_strided_slice %0 {offsets = [0, 29], sizes = [8, 137], strides = [1, 1]} : vector<8x256xf32> to vector<8x137xf32>
    %301 = tpu.iota {dimensions = array<i32: 1>} : vector<8x137xi32>
    %c4_i32 = arith.constant 4 : i32
    %302 = vector.broadcast %c4_i32 : i32 to vector<8x137xi32>
    %303 = arith.cmpi sge, %301, %302 : vector<8x137xi32>
    %c132_i32 = arith.constant 132 : i32
    %304 = vector.broadcast %c132_i32 : i32 to vector<8x137xi32>
    %305 = arith.cmpi slt, %301, %304 : vector<8x137xi32>
    %306 = arith.andi %303, %305 : vector<8x137xi1>
    %307 = arith.subf %300, %299 : vector<8x137xf32>
    %cst = arith.constant 0.000000e+00 : f32
    %308 = vector.broadcast %cst : f32 to vector<8x137xf32>
    %309 = arith.select %306, %307, %308 : vector<8x137xi1>, vector<8x137xf32>
    %c0_2 = arith.constant 0 : index
    %310 = memref.load %arg2[%c0_2] : memref<10xf32, #tpu.memory_space<smem>>
    %311 = vector.extract_strided_slice %309 {offsets = [0, 0], sizes = [8, 128], strides = [1, 1]} : vector<8x137xf32> to vector<8x128xf32>
    %312 = vector.broadcast %310 : f32 to vector<8x128xf32>
    %313 = arith.mulf %312, %311 : vector<8x128xf32>
    %c1_3 = arith.constant 1 : index
    %314 = memref.load %arg2[%c1_3] : memref<10xf32, #tpu.memory_space<smem>>
    %315 = vector.extract_strided_slice %309 {offsets = [0, 1], sizes = [8, 128], strides = [1, 1]} : vector<8x137xf32> to vector<8x128xf32>
    %316 = vector.broadcast %314 : f32 to vector<8x128xf32>
    %317 = arith.mulf %316, %315 : vector<8x128xf32>
    %318 = arith.addf %313, %317 : vector<8x128xf32>
    %c2_4 = arith.constant 2 : index
    %319 = memref.load %arg2[%c2_4] : memref<10xf32, #tpu.memory_space<smem>>
    %320 = vector.extract_strided_slice %309 {offsets = [0, 2], sizes = [8, 128], strides = [1, 1]} : vector<8x137xf32> to vector<8x128xf32>
    %321 = vector.broadcast %319 : f32 to vector<8x128xf32>
    %322 = arith.mulf %321, %320 : vector<8x128xf32>
    %323 = arith.addf %318, %322 : vector<8x128xf32>
    %c3_5 = arith.constant 3 : index
    %324 = memref.load %arg2[%c3_5] : memref<10xf32, #tpu.memory_space<smem>>
    %325 = vector.extract_strided_slice %309 {offsets = [0, 3], sizes = [8, 128], strides = [1, 1]} : vector<8x137xf32> to vector<8x128xf32>
    %326 = vector.broadcast %324 : f32 to vector<8x128xf32>
    %327 = arith.mulf %326, %325 : vector<8x128xf32>
    %328 = arith.addf %323, %327 : vector<8x128xf32>
    %c4_6 = arith.constant 4 : index
    %329 = memref.load %arg2[%c4_6] : memref<10xf32, #tpu.memory_space<smem>>
    %330 = vector.extract_strided_slice %309 {offsets = [0, 4], sizes = [8, 128], strides = [1, 1]} : vector<8x137xf32> to vector<8x128xf32>
    %331 = vector.broadcast %329 : f32 to vector<8x128xf32>
    %332 = arith.mulf %331, %330 : vector<8x128xf32>
    %333 = arith.addf %328, %332 : vector<8x128xf32>
    %c5_7 = arith.constant 5 : index
    %334 = memref.load %arg2[%c5_7] : memref<10xf32, #tpu.memory_space<smem>>
    %335 = vector.extract_strided_slice %309 {offsets = [0, 5], sizes = [8, 128], strides = [1, 1]} : vector<8x137xf32> to vector<8x128xf32>
    %336 = vector.broadcast %334 : f32 to vector<8x128xf32>
    %337 = arith.mulf %336, %335 : vector<8x128xf32>
    %338 = arith.addf %333, %337 : vector<8x128xf32>
    %c6_8 = arith.constant 6 : index
    %339 = memref.load %arg2[%c6_8] : memref<10xf32, #tpu.memory_space<smem>>
    %340 = vector.extract_strided_slice %309 {offsets = [0, 6], sizes = [8, 128], strides = [1, 1]} : vector<8x137xf32> to vector<8x128xf32>
    %341 = vector.broadcast %339 : f32 to vector<8x128xf32>
    %342 = arith.mulf %341, %340 : vector<8x128xf32>
    %343 = arith.addf %338, %342 : vector<8x128xf32>
    %c7_9 = arith.constant 7 : index
    %344 = memref.load %arg2[%c7_9] : memref<10xf32, #tpu.memory_space<smem>>
    %345 = vector.extract_strided_slice %309 {offsets = [0, 7], sizes = [8, 128], strides = [1, 1]} : vector<8x137xf32> to vector<8x128xf32>
    %346 = vector.broadcast %344 : f32 to vector<8x128xf32>
    %347 = arith.mulf %346, %345 : vector<8x128xf32>
    %348 = arith.addf %343, %347 : vector<8x128xf32>
    %c8_10 = arith.constant 8 : index
    %349 = memref.load %arg2[%c8_10] : memref<10xf32, #tpu.memory_space<smem>>
    %350 = vector.extract_strided_slice %309 {offsets = [0, 8], sizes = [8, 128], strides = [1, 1]} : vector<8x137xf32> to vector<8x128xf32>
    %351 = vector.broadcast %349 : f32 to vector<8x128xf32>
    %352 = arith.mulf %351, %350 : vector<8x128xf32>
    %353 = arith.addf %348, %352 : vector<8x128xf32>
    %c9_11 = arith.constant 9 : index
    %354 = memref.load %arg2[%c9_11] : memref<10xf32, #tpu.memory_space<smem>>
    %355 = vector.extract_strided_slice %309 {offsets = [0, 9], sizes = [8, 128], strides = [1, 1]} : vector<8x137xf32> to vector<8x128xf32>
    %356 = vector.broadcast %354 : f32 to vector<8x128xf32>
    %357 = arith.mulf %356, %355 : vector<8x128xf32>
    %358 = arith.addf %353, %357 : vector<8x128xf32>
    %c0_12 = arith.constant 0 : index
    %c0_13 = arith.constant 0 : index
    %359 = vector.load %arg4[%c0_12, %c0_13] : memref<8x128xf32, #tpu.memory_space<vmem>>, vector<8x128xf32>
    tpu.vector_store %arg4[%c0_12, %c0_13], %358 {strides = array<i32>} : memref<8x128xf32, #tpu.memory_space<vmem>>, vector<8x128xf32>,
    return
  }
  func.func @transform_0(%arg0: i32) -> i32 {
    %c0_i32 = arith.constant 0 : i32
    %c0_i32_0 = arith.constant 0 : i32
    return %c0_i32 : i32
  }
  func.func @transform_1(%arg0: i32) -> i32 {
    %c0_i32 = arith.constant 0 : i32
    %c0_i32_0 = arith.constant 0 : i32
    return %c0_i32 : i32
  }
  func.func @transform_2(%arg0: i32) -> (i32, i32) {
    %c0_i32 = arith.constant 0 : i32
    %c0_i32_0 = arith.constant 0 : i32
    return %arg0, %c0_i32 : i32, i32
  }
  func.func @transform_3(%arg0: i32) -> (i32, i32) {
    %c0_i32 = arith.constant 0 : i32
    %c0_i32_0 = arith.constant 0 : i32
    return %arg0, %c0_i32 : i32, i32
  }
}

</mosaic_0001>

<bundles_post_ra>
// kernel: cnn1d_model_pallas.1
= control target key start
LH: loop header
LB: loop body
LE: loop exit
PB: predicated region body
PF: predicated region fallthrough
CT: control target
= control target key end

     0   :  { %8 = vsyncpa [#allocation3], 0  ;;  %s1725_s0 = inlined_call_operand.vmem [shape: f32[60], index: 0, kind: input, shape index: {}]   ;;  %s1726_s1 = inlined_call_operand.vmem [shape: f32[10], index: 1, kind: input, shape index: {}]   ;;  %s1727_s2 = inlined_call_operand.vmem [shape: f32[8,256], index: 2, kind: input, shape index: {}]   ;;  %s1728_s3 = inlined_call_operand.vmem [shape: f32[8,128], index: 3, kind: output, shape index: {}]  }
   0x1   :  { %s15_s14 = sshll.u32 %s1725_s0, 4  ;;  %s16_s14 = int_to_ptr.vmem [resolvable:$true] %s15_s14 }
   0x2   :  { %9 = vsyncpa [#allocation5], 0  ;;  %s24_s17 = sshll.u32 %s1726_s1, 4  ;;  %s1308_s18 = smov [#allocation2]   ;;  %s25_s17 = int_to_ptr.vmem [resolvable:$true] %s24_s17 }
   0x3   :  { %18 = dma.vmem_to_smem %s16_s14, 16, %s1308_s18, [#allocation3]  }
   0x4   :  { %s1309_s19 = smov [#allocation4]  }
   0x5   :  { %27 = dma.vmem_to_smem %s25_s17, 16, %s1309_s19, [#allocation5]  }
   0x6   :  { %1304 = dma.done.wait [#allocation3], 16  }
   0x7   :  { %1305 = vsyncadd [#allocation3], 4294967280 }
   0x8   :  { %1306 = dma.done.wait [#allocation5], 16  }
   0x9   :  { %1307 = vsyncadd [#allocation5], 4294967280 }
   0xa   :  { %38 = sfence }
   0xb   :  { %s1149_s20 = sld [smem:[#allocation2 + $0x2]]  ;;  %v1399_v0 = vld [vmem:[%s1727_s2] sm:$0xff]  ;;  %s1310_s1 = smov 126   ;;  %v1407_v6 = vld [vmem:[%s1727_s2 + $0x8] sm:$0xff]  ;;  %vm87_vm0 = vcmask 1022976   ;;  %vm71_vm1 = vcmask 1031168  }
   0xc   :  { %s1148_s21 = sld [smem:[#allocation2 + $0x1]]  ;;  %s1311_s26 = smov 127   ;;  %vm55_vm2 = vcmask 1039360   ;;  %vm103_vm3 = vcmask 1014784   ;;  %vm135_vm4 = vcmask 998400   ;;  %vm119_vm5 = vcmask 1006592  }
   0xd   :  { %s1150_s22 = sld [smem:[#allocation2 + $0x3]]  ;;  %s1312_s28 = smov 125   ;;  %vm151_vm6 = vcmask 990208   ;;  %vm183_vm7 = vcmask 973824   ;;  %vm167_vm8 = vcmask 982016   ;;  %vm199_vm9 = vcmask 965632  }
   0xe   :  { %s1151_s27 = sld [smem:[#allocation2 + $0x4]]  ;;  %s1313_s4 = smov 124   ;;  %vm231_vm10 = vcmask 949248   ;;  %vm215_vm11 = vcmask 957440   ;;  %vm247_vm12 = vcmask 941056   ;;  %vm279_vm13 = vcmask 924672  }
   0xf   :  { %s1152_s29 = sld [smem:[#allocation2 + $0x5]]  ;;  %s1314_s6 = smov 123   ;;  %vm263_vm14 = vcmask 932864   ;;  %vm295_vm15 = vcmask 916480  }
  0x10   :  { %s1153_s30 = sld [smem:[#allocation2 + $0x6]]  ;;  %s1315_s8 = smov 122  }
  0x11   :  { %v62_v1 = vstv %s1149_s20  ;;  %s1154_s5 = sld [smem:[#allocation2 + $0x7]]  ;;  %s1316_s10 = smov 121  }
  0x12   :  { %v63_v2 = vmul.f32 %v62_v1, %v1399_v0  ;;  %v46_v3 = vstv %s1148_s21  ;;  %v64_v8 = vmul.f32 %v62_v1, %v1407_v6  ;;  %s1155_s7 = sld [smem:[#allocation2 + $0x8]]  ;;  %s1317_s12 = smov 120  }
  0x13   :  { %v47_v4 = vmul.f32 %v46_v3, %v1399_v0  ;;  %v78_v5 = vstv %s1150_s22  ;;  %v48_v9 = vmul.f32 %v46_v3, %v1407_v6  ;;  %s1156_s9 = sld [smem:[#allocation2 + $0x9]]  ;;  %s1318_s14 = smov 119  }
  0x14   :  { %67 = vrot.lane.b32.xlu1 %v63_v2, %s1310_s1  ;;  %v79_v7 = vmul.f32 %v78_v5, %v1399_v0  ;;  %v80_v10 = vmul.f32 %v78_v5, %v1407_v6  ;;  %v94_v11 = vstv %s1151_s27  ;;  %s1157_s11 = sld [smem:[#allocation2 + $0xa]]  ;;  %s1319_s16 = smov 118  }
  0x15   :  { %51 = vrot.lane.b32.xlu0 %v47_v4, %s1311_s26  ;;  %v96_v12 = vmul.f32 %v94_v11, %v1407_v6  ;;  %v95_v13 = vmul.f32 %v94_v11, %v1399_v0  ;;  %v110_v14 = vstv %s1152_s29  ;;  %s1158_s13 = sld [smem:[#allocation2 + $0xb]]  ;;  %s1320_s18 = smov 117  }
  0x16   :  { %83 = vrot.lane.b32.xlu2 %v79_v7, %s1312_s28  ;;  %v111_v15 = vmul.f32 %v110_v14, %v1399_v0  ;;  %v126_v16 = vstv %s1153_s30  ;;  %v112_v18 = vmul.f32 %v110_v14, %v1407_v6  ;;  %s1159_s15 = sld [smem:[#allocation2 + $0xc]]  ;;  %s1321_s20 = smov 116  }
  0x17   :  { %v127_v17 = vmul.f32 %v126_v16, %v1399_v0  ;;  %v128_v19 = vmul.f32 %v126_v16, %v1407_v6  ;;  %v142_v20 = vstv %s1154_s5  ;;  %s1160_s17 = sld [smem:[#allocation2 + $0xd]]  ;;  %s1322_s22 = smov 115  }
  0x18   :  { %v144_v21 = vmul.f32 %v142_v20, %v1407_v6  ;;  %v143_v22 = vmul.f32 %v142_v20, %v1399_v0  ;;  %v158_v23 = vstv %s1155_s7  ;;  %s1161_s19 = sld [smem:[#allocation2 + $0xe]]  ;;  %s1323_s23 = smov 114  }
  0x19   :  { %v159_v24 = vmul.f32 %v158_v23, %v1399_v0  ;;  %v174_v25 = vstv %s1156_s9  ;;  %v160_v27 = vmul.f32 %v158_v23, %v1407_v6  ;;  %s1162_s21 = sld [smem:[#allocation2 + $0xf]]  ;;  %s1324_s25 = smov 113  }
  0x1a   :  { %v175_v26 = vmul.f32 %v174_v25, %v1399_v0  ;;  %v176_v28 = vmul.f32 %v174_v25, %v1407_v6  ;;  %v190_v29 = vstv %s1157_s11  ;;  %s1163_s0 = sld [smem:[#allocation2 + $0x10]]  ;;  %s1325_s29 = smov 112  }
  0x1b   :  { %v192_v30 = vmul.f32 %v190_v29, %v1407_v6  ;;  %v191_v31 = vmul.f32 %v190_v29, %v1399_v0  ;;  %v206_v32 = vstv %s1158_s13  ;;  %s1164_s24 = sld [smem:[#allocation2 + $0x11]]  ;;  %s1326_s5 = smov 111  }
  0x1c   :  { %69 = vrot.lane.b32.xlu1 %v64_v8, %s1310_s1  ;;  %v207_v33 = vmul.f32 %v206_v32, %v1399_v0  ;;  %v222_v34 = vstv %s1159_s15  ;;  %v208_v36 = vmul.f32 %v206_v32, %v1407_v6  ;;  %s1165_s27 = sld [smem:[#allocation2 + $0x12]]  ;;  %s1327_s9 = smov 110  }
  0x1d   :  { %53 = vrot.lane.b32.xlu0 %v48_v9, %s1311_s26  ;;  %v223_v35 = vmul.f32 %v222_v34, %v1399_v0  ;;  %v224_v37 = vmul.f32 %v222_v34, %v1407_v6  ;;  %v238_v38 = vstv %s1160_s17  ;;  %s1166_s30 = sld [smem:[#allocation2 + $0x13]]  ;;  %s1328_s13 = smov 109  }
  0x1e   :  { %85 = vrot.lane.b32.xlu2 %v80_v10, %s1312_s28  ;;  %v240_v39 = vmul.f32 %v238_v38, %v1407_v6  ;;  %v239_v40 = vmul.f32 %v238_v38, %v1399_v0  ;;  %v254_v41 = vstv %s1161_s19  ;;  %s1167_s7 = sld [smem:[#allocation2 + $0x14]] }
  0x1f   :  { %v255_v42 = vmul.f32 %v254_v41, %v1399_v0  ;;  %v270_v43 = vstv %s1162_s21  ;;  %v256_v45 = vmul.f32 %v254_v41, %v1407_v6  ;;  %s1168_s11 = sld [smem:[#allocation2 + $0x15]]  ;;  %s1331_s21 = smov 106  }
  0x20   :  { %v271_v44 = vmul.f32 %v270_v43, %v1399_v0  ;;  %v272_v46 = vmul.f32 %v270_v43, %v1407_v6  ;;  %v286_v47 = vstv %s1163_s0  ;;  %s1169_s15 = sld [smem:[#allocation2 + $0x16]]  ;;  %s1332_s0 = smov 105  }
  0x21   :  { %v288_v48 = vmul.f32 %v286_v47, %v1407_v6  ;;  %v287_v49 = vmul.f32 %v286_v47, %v1399_v0  ;;  %v302_v50 = vstv %s1164_s24  ;;  %s1170_s17 = sld [smem:[#allocation2 + $0x17]]  ;;  %s1333_s24 = smov 104  }
  0x22   :  { %v303_v51 = vmul.f32 %v302_v50, %v1399_v0  ;;  %v318_v52 = vstv %s1165_s27  ;;  %v304_v54 = vmul.f32 %v302_v50, %v1407_v6  ;;  %s1171_s19 = sld [smem:[#allocation2 + $0x18]]  ;;  %s1334_s27 = smov 103  }
  0x23   :  { %v319_v53 = vmul.f32 %v318_v52, %v1399_v0  ;;  %v320_v55 = vmul.f32 %v318_v52, %v1407_v6  ;;  %v334_v56 = vstv %s1166_s30  ;;  %s1335_s30 = smov 102  }
  0x24   :  { %101 = vrot.lane.b32.xlu1 %v96_v12, %s1313_s4  ;;  %v336_v57 = vmul.f32 %v334_v56, %v1407_v6  ;;  %v335_v58 = vmul.f32 %v334_v56, %v1399_v0  ;;  %v350_v60 = vstv %s1167_s7  ;;  %s1336_s7 = smov 101  }
  0x25   :  { %99 = vrot.lane.b32.xlu0 %v95_v13, %s1313_s4  ;;  %v351_v61 = vmul.f32 %v350_v60, %v1399_v0  ;;  %v366_v62 = vstv %s1168_s11  ;;  %v352_v1 = vmul.f32 %v350_v60, %v1407_v6  ;;  %s1337_s11 = smov 100  }
  0x26   :  { %115 = vrot.lane.b32.xlu2 %v111_v15, %s1314_s6  ;;  %v367_v63 = vmul.f32 %v366_v62, %v1399_v0  ;;  %v368_v4 = vmul.f32 %v366_v62, %v1407_v6  ;;  %v382_v5 = vstv %s1169_s15  ;;  %s1338_s15 = smov 99  }
  0x27   :  { %v384_v7 = vmul.f32 %v382_v5, %v1407_v6  ;;  %v383_v8 = vmul.f32 %v382_v5, %v1399_v0  ;;  %v398_v10 = vstv %s1170_s17  ;;  %s1339_s17 = smov 98  }
  0x28   :  { %v399_v11 = vmul.f32 %v398_v10, %v1399_v0  ;;  %v414_v12 = vstv %s1171_s19  ;;  %v400_v16 = vmul.f32 %v398_v10, %v1407_v6  ;;  %s1340_s19 = smov 97  }
  0x29   :  { %v415_v15 = vmul.f32 %v414_v12, %v1399_v0 }
  0x2c   :  { %131 = vrot.lane.b32.xlu1 %v127_v17, %s1315_s8 }
  0x2d   :  { %117 = vrot.lane.b32.xlu0 %v112_v18, %s1314_s6 }
  0x2e   :  { %133 = vrot.lane.b32.xlu2 %v128_v19, %s1315_s8  ;;  %v416_v19 = vmul.f32 %v414_v12, %v1407_v6 }
  0x34   :  { %149 = vrot.lane.b32.xlu1 %v144_v21, %s1316_s10 }
  0x35   :  { %147 = vrot.lane.b32.xlu0 %v143_v22, %s1316_s10 }
  0x36   :  { %163 = vrot.lane.b32.xlu2 %v159_v24, %s1317_s12 }
  0x3c   :  { %179 = vrot.lane.b32.xlu1 %v175_v26, %s1318_s14 }
  0x3d   :  { %165 = vrot.lane.b32.xlu0 %v160_v27, %s1317_s12 }
  0x3e   :  { %181 = vrot.lane.b32.xlu2 %v176_v28, %s1318_s14 }
  0x44   :  { %197 = vrot.lane.b32.xlu1 %v192_v30, %s1319_s16 }
  0x45   :  { %195 = vrot.lane.b32.xlu0 %v191_v31, %s1319_s16  ;;  %s1329_s16 = smov 108  }
  0x46   :  { %211 = vrot.lane.b32.xlu2 %v207_v33, %s1320_s18 }
  0x4c   :  { %227 = vrot.lane.b32.xlu1 %v223_v35, %s1321_s20 }
  0x4d   :  { %213 = vrot.lane.b32.xlu0 %v208_v36, %s1320_s18  ;;  %s1330_s18 = smov 107  }
  0x4e   :  { %229 = vrot.lane.b32.xlu2 %v224_v37, %s1321_s20  ;;  %s41_s20 = sld [smem:[#allocation2]] }
  0x54   :  { %245 = vrot.lane.b32.xlu1 %v240_v39, %s1322_s22  ;;  %v42_v17 = vstv %s41_s20  ;;  %s1181_s20 = sld [smem:[#allocation2 + $0x22]] }
  0x55   :  { %243 = vrot.lane.b32.xlu0 %v239_v40, %s1322_s22  ;;  %s1172_s22 = sld [smem:[#allocation2 + $0x19]]  ;;  %v44_v20 = vmul.f32 %v42_v17, %v1407_v6  ;;  %v43_v21 = vmul.f32 %v42_v17, %v1399_v0 }
  0x56   :  { %259 = vrot.lane.b32.xlu2 %v255_v42, %s1323_s23 }
  0x5b   :  { %v430_v22 = vstv %s1172_s22  ;;  %s1534_s22 = sld [smem:[#allocation2 + $0x23]] }
  0x5c   :  { %275 = vrot.lane.b32.xlu1 %v271_v44, %s1324_s25  ;;  %v432_v28 = vmul.f32 %v430_v22, %v1407_v6  ;;  %v431_v30 = vmul.f32 %v430_v22, %v1399_v0 }
  0x5d   :  { %261 = vrot.lane.b32.xlu0 %v256_v45, %s1323_s23  ;;  %s1476_s23 = sld [smem:[#allocation2 + $0x1a]] }
  0x5e   :  { %277 = vrot.lane.b32.xlu2 %v272_v46, %s1324_s25  ;;  %s1481_s25 = sld [smem:[#allocation2 + $0x1b]] }
  0x63   :  { %v446_v33 = vstv %s1476_s23  ;;  %s1537_s23 = sld [smem:[#allocation2 + $0x24]] }
  0x64   :  { %293 = vrot.lane.b32.xlu1 %v288_v48, %s1325_s29  ;;  %v447_v35 = vmul.f32 %v446_v33, %v1399_v0  ;;  %v462_v38 = vstv %s1481_s25  ;;  %v448_v45 = vmul.f32 %v446_v33, %v1407_v6  ;;  %s1184_s25 = sld [smem:[#allocation2 + $0x25]] }
  0x65   :  { %291 = vrot.lane.b32.xlu0 %v287_v49, %s1325_s29  ;;  %s1175_s29 = sld [smem:[#allocation2 + $0x1c]]  ;;  %v463_v43 = vmul.f32 %v462_v38, %v1399_v0  ;;  %v464_v47 = vmul.f32 %v462_v38, %v1407_v6 }
  0x66   :  { %307 = vrot.lane.b32.xlu2 %v303_v51, %s1326_s5 }
  0x6b   :  { %v478_v48 = vstv %s1175_s29  ;;  %s1549_s29 = sld [smem:[#allocation2 + $0x26]] }
  0x6c   :  { %323 = vrot.lane.b32.xlu1 %v319_v53, %s1327_s9  ;;  %v479_v56 = vmul.f32 %v478_v48, %v1399_v0 }
  0x6d   :  { %309 = vrot.lane.b32.xlu0 %v304_v54, %s1326_s5  ;;  %s1495_s5 = sld [smem:[#allocation2 + $0x1d]]  ;;  %v480_v54 = vmul.f32 %v478_v48, %v1407_v6  ;;  %v606_v48 = vstv %s1537_s23  ;;  %s1352_s23 = smov 85  }
  0x6e   :  { %325 = vrot.lane.b32.xlu2 %v320_v55, %s1327_s9  ;;  %s1498_s9 = sld [smem:[#allocation2 + $0x1e]] }
  0x70   :  { %v84_v59 = vpop.permute.xlu2 %83 }
  0x74   :  { %341 = vrot.lane.b32.xlu1 %v336_v57, %s1328_s13  ;;  %v510_v62 = vstv %s1498_s9  ;;  %s1187_s9 = sld [smem:[#allocation2 + $0x28]] }
  0x75   :  { %339 = vrot.lane.b32.xlu0 %v335_v58, %s1328_s13  ;;  %s1178_s13 = sld [smem:[#allocation2 + $0x1f]] }
  0x76   :  { %355 = vrot.lane.b32.xlu2 %v351_v61, %s1329_s16 }
  0x78   :  { %v86_v2 = vpop.permute.xlu2 %85 }
  0x79   :  { %v88_v3 = vsel %vm87_vm0, %v84_v59, %v86_v2  ;;  %v494_v59 = vstv %s1495_s5  ;;  %s1552_s5 = sld [smem:[#allocation2 + $0x27]] }
  0x7a   :  { %v495_v61 = vmul.f32 %v494_v59, %v1399_v0 }
  0x7b   :  { %v526_v10 = vstv %s1178_s13  ;;  %s1564_s13 = sld [smem:[#allocation2 + $0x29]] }
  0x7c   :  { %371 = vrot.lane.b32.xlu1 %v367_v63, %s1330_s18 }
  0x7d   :  { %357 = vrot.lane.b32.xlu0 %v352_v1, %s1329_s16  ;;  %s1516_s16 = sld [smem:[#allocation2 + $0x20]] }
  0x7e   :  { %373 = vrot.lane.b32.xlu2 %v368_v4, %s1330_s18  ;;  %v511_v4 = vmul.f32 %v510_v62, %v1399_v0  ;;  %s1520_s18 = sld [smem:[#allocation2 + $0x21]] }
  0x80   :  { %v1469_v9 = vpop.permute.xlu2 %115 }
  0x84   :  { %389 = vrot.lane.b32.xlu1 %v384_v7, %s1331_s21  ;;  %v496_v7 = vmul.f32 %v494_v59, %v1407_v6 }
  0x85   :  { %387 = vrot.lane.b32.xlu0 %v383_v8, %s1331_s21  ;;  %s1341_s21 = smov 96  }
  0x86   :  { %v68_v13 = vpop.permute.xlu1 %67  ;;  %403 = vrot.lane.b32.xlu2 %v399_v11, %s1332_s0 }
  0x87   :  { %v52_v14 = vpop.permute.xlu0 %51 }
  0x88   :  { %v1474_v18 = vpop.permute.xlu2 %133 }
  0x8c   :  { %419 = vrot.lane.b32.xlu1 %v415_v15, %s1333_s24 }
  0x8d   :  { %405 = vrot.lane.b32.xlu0 %v400_v16, %s1332_s0  ;;  %v528_v16 = vmul.f32 %v526_v10, %v1407_v6  ;;  %s1342_s0 = smov 95  }
  0x8e   :  { %v70_v23 = vpop.permute.xlu1 %69  ;;  %421 = vrot.lane.b32.xlu2 %v416_v19, %s1333_s24  ;;  %s1343_s24 = smov 94  }
  0x8f   :  { %v72_v24 = vsel %vm71_vm1, %v68_v13, %v70_v23  ;;  %v54_v25 = vpop.permute.xlu0 %53 }
  0x90   :  { %v56_v26 = vsel %vm55_vm2, %v52_v14, %v54_v25  ;;  %v60_v27 = vadd.f32 %v54_v25, %v44_v20  ;;  %v1487_v31 = vpop.permute.xlu2 %163 }
  0x91   :  { %v59_v29 = vadd.f32 %v56_v26, %v43_v21  ;;  %v542_v21 = vstv %s1516_s16  ;;  %s1348_s16 = smov 89  }
  0x92   :  { %v76_v32 = vadd.f32 %v70_v23, %v60_v27  ;;  %v543_v23 = vmul.f32 %v542_v21, %v1399_v0 }
  0x93   :  { %v75_v34 = vadd.f32 %v72_v24, %v59_v29  ;;  %v558_v24 = vstv %s1520_s18  ;;  %s1349_s18 = smov 88  }
  0x94   :  { %v92_v36 = vadd.f32 %v86_v2, %v76_v32  ;;  %437 = vrot.lane.b32.xlu1 %v432_v28, %s1334_s27  ;;  %v559_v29 = vmul.f32 %v558_v24, %v1399_v0  ;;  %v560_v33 = vmul.f32 %v558_v24, %v1407_v6 }
  0x95   :  { %v91_v37 = vadd.f32 %v88_v3, %v75_v34  ;;  %435 = vrot.lane.b32.xlu0 %v431_v30, %s1334_s27  ;;  %v574_v34 = vstv %s1181_s20  ;;  %s1344_s27 = smov 93   ;;  %s1350_s20 = smov 87  }
  0x96   :  { %v102_v39 = vpop.permute.xlu1 %101  ;;  %451 = vrot.lane.b32.xlu2 %v447_v35, %s1335_s30 }
  0x97   :  { %v108_v40 = vadd.f32 %v102_v39, %v92_v36  ;;  %v100_v41 = vpop.permute.xlu0 %99 }
  0x98   :  { %v104_v42 = vsel %vm103_vm3, %v100_v41, %v102_v39  ;;  %v182_v46 = vpop.permute.xlu2 %181 }
  0x99   :  { %v107_v44 = vadd.f32 %v104_v42, %v91_v37  ;;  %v575_v42 = vmul.f32 %v574_v34, %v1399_v0 }
  0x9c   :  { %467 = vrot.lane.b32.xlu1 %v463_v43, %s1336_s7 }
  0x9d   :  { %453 = vrot.lane.b32.xlu0 %v448_v45, %s1335_s30  ;;  %v590_v45 = vstv %s1534_s22  ;;  %s1345_s30 = smov 92   ;;  %s1351_s22 = smov 86  }
  0x9e   :  { %v132_v49 = vpop.permute.xlu1 %131  ;;  %469 = vrot.lane.b32.xlu2 %v464_v47, %s1336_s7  ;;  %v591_v47 = vmul.f32 %v590_v45, %v1399_v0  ;;  %s1346_s7 = smov 91  }
  0x9f   :  { %v118_v50 = vpop.permute.xlu0 %117  ;;  %v136_v51 = vsel %vm135_vm4, %v132_v49, %v1474_v18 }
  0xa0   :  { %v120_v52 = vsel %vm119_vm5, %v1469_v9, %v118_v50  ;;  %v124_v53 = vadd.f32 %v118_v50, %v108_v40  ;;  %v1506_v57 = vpop.permute.xlu2 %211  ;;  %v512_v9 = vmul.f32 %v510_v62, %v1407_v6  ;;  %v576_v40 = vmul.f32 %v574_v34, %v1407_v6 }
  0xa1   :  { %v123_v55 = vadd.f32 %v120_v52, %v107_v44 }
  0xa2   :  { %v140_v58 = vadd.f32 %v1474_v18, %v124_v53  ;;  %v527_v18 = vmul.f32 %v526_v10, %v1399_v0  ;;  %v607_v53 = vmul.f32 %v606_v48, %v1399_v0  ;;  %v654_v10 = vstv %s1552_s5  ;;  %s1355_s5 = smov 82  }
  0xa3   :  { %v139_v60 = vadd.f32 %v136_v51, %v123_v55  ;;  %v592_v55 = vmul.f32 %v590_v45, %v1407_v6 }
  0xa4   :  { %485 = vrot.lane.b32.xlu1 %v480_v54, %s1337_s11 }
  0xa5   :  { %483 = vrot.lane.b32.xlu0 %v479_v56, %s1337_s11  ;;  %s1347_s11 = smov 90  }
  0xa6   :  { %v150_v63 = vpop.permute.xlu1 %149  ;;  %499 = vrot.lane.b32.xlu2 %v495_v61, %s1338_s15 }
  0xa7   :  { %v156_v1 = vadd.f32 %v150_v63, %v140_v58  ;;  %v148_v2 = vpop.permute.xlu0 %147  ;;  %v622_v58 = vstv %s1184_s25  ;;  %s1353_s25 = smov 84  }
  0xa8   :  { %v152_v3 = vsel %vm151_vm6, %v148_v2, %v150_v63  ;;  %v230_v8 = vpop.permute.xlu2 %229 }
  0xa9   :  { %v155_v5 = vadd.f32 %v152_v3, %v139_v60  ;;  %v623_v3 = vmul.f32 %v622_v58, %v1399_v0 }
  0xac   :  { %515 = vrot.lane.b32.xlu1 %v511_v4, %s1339_s17 }
  0xad   :  { %501 = vrot.lane.b32.xlu0 %v496_v7, %s1338_s15  ;;  %v638_v7 = vstv %s1549_s29  ;;  %s1354_s29 = smov 83  }
  0xae   :  { %v180_v11 = vpop.permute.xlu1 %179  ;;  %517 = vrot.lane.b32.xlu2 %v512_v9, %s1339_s17  ;;  %v639_v9 = vmul.f32 %v638_v7, %v1399_v0  ;;  %s1567_s17 = sld [smem:[#allocation2 + $0x2a]] }
  0xaf   :  { %v166_v12 = vpop.permute.xlu0 %165  ;;  %v184_v13 = vsel %vm183_vm7, %v180_v11, %v182_v46 }
  0xb0   :  { %v168_v14 = vsel %vm167_vm8, %v1487_v31, %v166_v12  ;;  %v172_v15 = vadd.f32 %v166_v12, %v156_v1  ;;  %v1527_v19 = vpop.permute.xlu2 %259  ;;  %v544_v31 = vmul.f32 %v542_v21, %v1407_v6  ;;  %v624_v1 = vmul.f32 %v622_v58, %v1407_v6 }
  0xb1   :  { %v171_v17 = vadd.f32 %v168_v14, %v155_v5 }
  0xb2   :  { %v188_v20 = vadd.f32 %v182_v46, %v172_v15  ;;  %v655_v15 = vmul.f32 %v654_v10, %v1399_v0 }
  0xb3   :  { %v187_v22 = vadd.f32 %v184_v13, %v171_v17  ;;  %v640_v17 = vmul.f32 %v638_v7, %v1407_v6 }
  0xb4   :  { %533 = vrot.lane.b32.xlu1 %v528_v16, %s1340_s19  ;;  %v702_v34 = vstv %s1567_s17  ;;  %s1366_s17 = smov 71  }
  0xb5   :  { %531 = vrot.lane.b32.xlu0 %v527_v18, %s1340_s19  ;;  %s1190_s19 = sld [smem:[#allocation2 + $0x2b]] }
  0xb6   :  { %v198_v25 = vpop.permute.xlu1 %197  ;;  %547 = vrot.lane.b32.xlu2 %v543_v23, %s1341_s21 }
  0xb7   :  { %v204_v26 = vadd.f32 %v198_v25, %v188_v20  ;;  %v196_v27 = vpop.permute.xlu0 %195  ;;  %v670_v20 = vstv %s1187_s9  ;;  %s1356_s9 = smov 81  }
  0xb8   :  { %v200_v28 = vsel %vm199_vm9, %v196_v27, %v198_v25  ;;  %v278_v32 = vpop.permute.xlu2 %277  ;;  %vm327_vm9 = vcmask 900096  }
  0xb9   :  { %v203_v30 = vadd.f32 %v200_v28, %v187_v22  ;;  %v671_v28 = vmul.f32 %v670_v20, %v1399_v0 }
  0xbc   :  { %563 = vrot.lane.b32.xlu1 %v559_v29, %s1342_s0 }
  0xbd   :  { %549 = vrot.lane.b32.xlu0 %v544_v31, %s1341_s21  ;;  %v686_v31 = vstv %s1564_s13  ;;  %s1579_s21 = sld [smem:[#allocation2 + $0x2c]]  ;;  %s1357_s13 = smov 80  }
  0xbe   :  { %v228_v35 = vpop.permute.xlu1 %227  ;;  %565 = vrot.lane.b32.xlu2 %v560_v33, %s1342_s0  ;;  %v687_v33 = vmul.f32 %v686_v31, %v1399_v0  ;;  %s1582_s0 = sld [smem:[#allocation2 + $0x2d]] }
  0xbf   :  { %v214_v36 = vpop.permute.xlu0 %213  ;;  %v232_v37 = vsel %vm231_vm10, %v228_v35, %v230_v8  ;;  %vm311_vm10 = vcmask 908288  }
  0xc0   :  { %v216_v38 = vsel %vm215_vm11, %v1506_v57, %v214_v36  ;;  %v220_v39 = vadd.f32 %v214_v36, %v204_v26  ;;  %v1542_v43 = vpop.permute.xlu2 %307  ;;  %v608_v57 = vmul.f32 %v606_v48, %v1407_v6  ;;  %v672_v26 = vmul.f32 %v670_v20, %v1407_v6 }
  0xc1   :  { %v219_v41 = vadd.f32 %v216_v38, %v203_v30  ;;  %vm343_vm11 = vcmask 891904  }
  0xc2   :  { %v236_v44 = vadd.f32 %v230_v8, %v220_v39  ;;  %v703_v39 = vmul.f32 %v702_v34, %v1399_v0 }
  0xc3   :  { %v235_v46 = vadd.f32 %v232_v37, %v219_v41  ;;  %v688_v41 = vmul.f32 %v686_v31, %v1407_v6 }
  0xc4   :  { %581 = vrot.lane.b32.xlu1 %v576_v40, %s1343_s24  ;;  %v750_v58 = vstv %s1582_s0  ;;  %s1680_s0 = sld [smem:[#allocation4 + $0x1]] }
  0xc5   :  { %579 = vrot.lane.b32.xlu0 %v575_v42, %s1343_s24  ;;  %s1193_s24 = sld [smem:[#allocation2 + $0x2e]] }
  0xc6   :  { %v246_v49 = vpop.permute.xlu1 %245  ;;  %595 = vrot.lane.b32.xlu2 %v591_v47, %s1344_s27 }
  0xc7   :  { %v252_v50 = vadd.f32 %v246_v49, %v236_v44  ;;  %v244_v51 = vpop.permute.xlu0 %243  ;;  %v718_v44 = vstv %s1190_s19  ;;  %s1358_s19 = smov 79  }
  0xc8   :  { %v248_v52 = vsel %vm247_vm12, %v244_v51, %v246_v49  ;;  %v326_v56 = vpop.permute.xlu2 %325  ;;  %vm375_vm12 = vcmask 875520  }
  0xc9   :  { %v251_v54 = vadd.f32 %v248_v52, %v235_v46  ;;  %v719_v52 = vmul.f32 %v718_v44, %v1399_v0 }
  0xcc   :  { %611 = vrot.lane.b32.xlu1 %v607_v53, %s1345_s30 }
  0xcd   :  { %597 = vrot.lane.b32.xlu0 %v592_v55, %s1344_s27  ;;  %v734_v55 = vstv %s1579_s21  ;;  %s1594_s27 = sld [smem:[#allocation2 + $0x2f]]  ;;  %s1359_s21 = smov 78  }
  0xce   :  { %v276_v59 = vpop.permute.xlu1 %275  ;;  %613 = vrot.lane.b32.xlu2 %v608_v57, %s1345_s30  ;;  %v735_v57 = vmul.f32 %v734_v55, %v1399_v0  ;;  %s1597_s30 = sld [smem:[#allocation2 + $0x30]] }
  0xcf   :  { %v262_v60 = vpop.permute.xlu0 %261  ;;  %v280_v61 = vsel %vm279_vm13, %v276_v59, %v278_v32  ;;  %vm359_vm13 = vcmask 883712  }
  0xd0   :  { %v264_v62 = vsel %vm263_vm14, %v1527_v19, %v262_v60  ;;  %v268_v63 = vadd.f32 %v262_v60, %v252_v50  ;;  %v1557_v4 = vpop.permute.xlu2 %355  ;;  %v656_v19 = vmul.f32 %v654_v10, %v1407_v6  ;;  %v720_v50 = vmul.f32 %v718_v44, %v1407_v6 }
  0xd1   :  { %v267_v2 = vadd.f32 %v264_v62, %v251_v54  ;;  %vm391_vm14 = vcmask 867328  }
  0xd2   :  { %v284_v5 = vadd.f32 %v278_v32, %v268_v63  ;;  %v751_v63 = vmul.f32 %v750_v58, %v1399_v0 }
  0xd3   :  { %v283_v8 = vadd.f32 %v280_v61, %v267_v2  ;;  %v736_v2 = vmul.f32 %v734_v55, %v1407_v6 }
  0xd4   :  { %629 = vrot.lane.b32.xlu1 %v624_v1, %s1346_s7  ;;  %v798_v20 = vstv %s1597_s30  ;;  %s1650_s30 = sld [smem:[#allocation2 + $0x38]] }
  0xd5   :  { %627 = vrot.lane.b32.xlu0 %v623_v3, %s1346_s7  ;;  %s1196_s7 = sld [smem:[#allocation2 + $0x31]] }
  0xd6   :  { %v294_v11 = vpop.permute.xlu1 %293  ;;  %643 = vrot.lane.b32.xlu2 %v639_v9, %s1347_s11 }
  0xd7   :  { %v300_v12 = vadd.f32 %v294_v11, %v284_v5  ;;  %v292_v13 = vpop.permute.xlu0 %291  ;;  %v766_v5 = vstv %s1193_s24  ;;  %s1360_s24 = smov 77  }
  0xd8   :  { %v296_v14 = vsel %vm295_vm15, %v292_v13, %v294_v11  ;;  %v374_v18 = vpop.permute.xlu2 %373  ;;  %vm423_vm15 = vcmask 850944  }
  0xd9   :  { %v299_v16 = vadd.f32 %v296_v14, %v283_v8  ;;  %v767_v14 = vmul.f32 %v766_v5, %v1399_v0 }
  0xdc   :  { %659 = vrot.lane.b32.xlu1 %v655_v15, %s1348_s16 }
  0xdd   :  { %645 = vrot.lane.b32.xlu0 %v640_v17, %s1347_s11  ;;  %v782_v17 = vstv %s1594_s27  ;;  %s1609_s11 = sld [smem:[#allocation2 + $0x32]] }
  0xde   :  { %v324_v21 = vpop.permute.xlu1 %323  ;;  %661 = vrot.lane.b32.xlu2 %v656_v19, %s1348_s16  ;;  %v783_v19 = vmul.f32 %v782_v17, %v1399_v0  ;;  %s1612_s16 = sld [smem:[#allocation2 + $0x33]] }
  0xdf   :  { %v310_v22 = vpop.permute.xlu0 %309  ;;  %v328_v23 = vsel %vm327_vm9, %v324_v21, %v326_v56  ;;  %vm407_vm9 = vcmask 859136   ;;  %s1202_s27 = sld [smem:[#allocation2 + $0x37]] }
  0xe0   :  { %v312_v24 = vsel %vm311_vm10, %v1542_v43, %v310_v22  ;;  %v316_v25 = vadd.f32 %v310_v22, %v300_v12  ;;  %v1572_v29 = vpop.permute.xlu2 %403  ;;  %v704_v43 = vmul.f32 %v702_v34, %v1407_v6  ;;  %v768_v12 = vmul.f32 %v766_v5, %v1407_v6 }
  0xe1   :  { %v315_v27 = vadd.f32 %v312_v24, %v299_v16  ;;  %vm439_vm10 = vcmask 842752  }
  0xe2   :  { %v332_v30 = vadd.f32 %v326_v56, %v316_v25  ;;  %v799_v25 = vmul.f32 %v798_v20, %v1399_v0 }
  0xe3   :  { %v331_v32 = vadd.f32 %v328_v23, %v315_v27  ;;  %v784_v27 = vmul.f32 %v782_v17, %v1407_v6 }
  0xe4   :  { %677 = vrot.lane.b32.xlu1 %v672_v26, %s1349_s18 }
  0xe5   :  { %675 = vrot.lane.b32.xlu0 %v671_v28, %s1349_s18  ;;  %s1367_s18 = smov 70  }
  0xe6   :  { %v342_v35 = vpop.permute.xlu1 %341  ;;  %691 = vrot.lane.b32.xlu2 %v687_v33, %s1350_s20 }
  0xe7   :  { %v348_v36 = vadd.f32 %v342_v35, %v332_v30  ;;  %v340_v37 = vpop.permute.xlu0 %339  ;;  %v814_v30 = vstv %s1196_s7  ;;  %s1653_s7 = sld [smem:[#allocation2 + $0x39]] }
  0xe8   :  { %v344_v38 = vsel %vm343_vm11, %v340_v37, %v342_v35  ;;  %v422_v42 = vpop.permute.xlu2 %421  ;;  %vm471_vm11 = vcmask 826368  }
  0xe9   :  { %v347_v40 = vadd.f32 %v344_v38, %v331_v32  ;;  %v815_v38 = vmul.f32 %v814_v30, %v1399_v0 }
  0xec   :  { %707 = vrot.lane.b32.xlu1 %v703_v39, %s1351_s22 }
  0xed   :  { %693 = vrot.lane.b32.xlu0 %v688_v41, %s1350_s20  ;;  %v830_v41 = vstv %s1609_s11  ;;  %s1199_s20 = sld [smem:[#allocation2 + $0x34]] }
  0xee   :  { %v372_v45 = vpop.permute.xlu1 %371  ;;  %709 = vrot.lane.b32.xlu2 %v704_v43, %s1351_s22  ;;  %v1623_v43 = vld [vmem:[%s1727_s2] sm:$0xff]  ;;  %s1205_s11 = sld [smem:[#allocation2 + $0x3a]] }
  0xef   :  { %v358_v46 = vpop.permute.xlu0 %357  ;;  %v376_v47 = vsel %vm375_vm12, %v372_v45, %v374_v18  ;;  %vm455_vm12 = vcmask 834560   ;;  %v831_v44 = vmul.f32 %v1623_v43, %v830_v41  ;;  %s1678_s22 = sld [smem:[#allocation4 + $0x2]] }
  0xf0   :  { %v360_v48 = vsel %vm359_vm13, %v1557_v4, %v358_v46  ;;  %v364_v49 = vadd.f32 %v358_v46, %v348_v36  ;;  %v1587_v53 = vpop.permute.xlu2 %451  ;;  %v752_v4 = vmul.f32 %v750_v58, %v1407_v6  ;;  %v816_v36 = vmul.f32 %v814_v30, %v1407_v6 }
  0xf1   :  { %v363_v51 = vadd.f32 %v360_v48, %v347_v40  ;;  %vm487_vm13 = vcmask 818176   ;;  %v942_v30 = vstv %s1653_s7 }
  0xf2   :  { %v380_v54 = vadd.f32 %v374_v18, %v364_v49 }
  0xf3   :  { %v379_v56 = vadd.f32 %v376_v47, %v363_v51 }
  0xf4   :  { %725 = vrot.lane.b32.xlu1 %v720_v50, %s1352_s23  ;;  %v1631_v50 = vld [vmem:[%s1727_s2 + $0x8] sm:$0xff]  ;;  %s1361_s2 = smov 76  }
  0xf5   :  { %723 = vrot.lane.b32.xlu0 %v719_v52, %s1352_s23  ;;  %v832_v51 = vmul.f32 %v1631_v50, %v830_v41  ;;  %s1634_s23 = sld [smem:[#allocation2 + $0x35]] }
  0xf6   :  { %v390_v59 = vpop.permute.xlu1 %389  ;;  %739 = vrot.lane.b32.xlu2 %v735_v57, %s1353_s25 }
  0xf7   :  { %v396_v60 = vadd.f32 %v390_v59, %v380_v54  ;;  %v388_v61 = vpop.permute.xlu0 %387  ;;  %v862_v54 = vstv %s1199_s20  ;;  %s1369_s20 = smov 29  }
  0xf8   :  { %v392_v62 = vsel %vm391_vm14, %v388_v61, %v390_v59  ;;  %v470_v3 = vpop.permute.xlu2 %469  ;;  %vm519_vm14 = vcmask 801792  }
  0xf9   :  { %v395_v1 = vadd.f32 %v392_v62, %v379_v56  ;;  %v863_v62 = vmul.f32 %v1623_v43, %v862_v54 }
  0xfc   :  { %755 = vrot.lane.b32.xlu1 %v751_v63, %s1354_s29 }
  0xfd   :  { %741 = vrot.lane.b32.xlu0 %v736_v2, %s1353_s25  ;;  %s1637_s25 = sld [smem:[#allocation2 + $0x36]]  ;;  %v878_v2 = vstv %s1634_s23 }
  0xfe   :  { %v420_v7 = vpop.permute.xlu1 %419  ;;  %757 = vrot.lane.b32.xlu2 %v752_v4, %s1354_s29  ;;  %v879_v4 = vmul.f32 %v1623_v43, %v878_v2  ;;  %s1362_s29 = smov 75   ;;  %s1682_s23 = sld [smem:[#allocation4 + $0x6]] }
  0xff   :  { %v406_v8 = vpop.permute.xlu0 %405  ;;  %v424_v9 = vsel %vm423_vm15, %v420_v7, %v422_v42  ;;  %vm503_vm15 = vcmask 809984  }
 0x100   :  { %v408_v10 = vsel %vm407_vm9, %v1572_v29, %v406_v8  ;;  %v412_v11 = vadd.f32 %v406_v8, %v396_v60  ;;  %v1602_v15 = vpop.permute.xlu2 %499  ;;  %v800_v29 = vmul.f32 %v798_v20, %v1407_v6  ;;  %v846_v6 = vstv %s1612_s16  ;;  %s1663_s16 = sld [smem:[#allocation2 + $0x3b]] }
 0x101   :  { %v411_v13 = vadd.f32 %v408_v10, %v395_v1  ;;  %v847_v48 = vmul.f32 %v1623_v43, %v846_v6  ;;  %v864_v60 = vmul.f32 %v1631_v50, %v862_v54  ;;  %vm535_vm9 = vcmask 793600  }
 0x102   :  { %v428_v16 = vadd.f32 %v422_v42, %v412_v11 }
 0x103   :  { %v427_v18 = vadd.f32 %v424_v9, %v411_v13  ;;  %v894_v5 = vstv %s1637_s25  ;;  %v880_v13 = vmul.f32 %v1631_v50, %v878_v2  ;;  %s1213_s25 = sld [smem:[#allocation4 + $0x7]] }
 0x104   :  { %773 = vrot.lane.b32.xlu1 %v768_v12, %s1355_s5  ;;  %v895_v11 = vmul.f32 %v1623_v43, %v894_v5 }
 0x105   :  { %771 = vrot.lane.b32.xlu0 %v767_v14, %s1355_s5  ;;  %s1363_s5 = smov 74  }
 0x106   :  { %v438_v21 = vpop.permute.xlu1 %437  ;;  %787 = vrot.lane.b32.xlu2 %v783_v19, %s1356_s9 }
 0x107   :  { %v444_v22 = vadd.f32 %v438_v21, %v428_v16  ;;  %v436_v23 = vpop.permute.xlu0 %435  ;;  %v910_v16 = vstv %s1202_s27  ;;  %s1215_s27 = sld [smem:[#allocation4 + $0x9]] }
 0x108   :  { %v440_v24 = vsel %vm439_vm10, %v436_v23, %v438_v21  ;;  %v518_v28 = vpop.permute.xlu2 %517  ;;  %vm567_vm10 = vcmask 777216  }
 0x109   :  { %v443_v26 = vadd.f32 %v440_v24, %v427_v18  ;;  %v911_v24 = vmul.f32 %v1623_v43, %v910_v16 }
 0x10c   :  { %803 = vrot.lane.b32.xlu1 %v799_v25, %s1357_s13 }
 0x10d   :  { %789 = vrot.lane.b32.xlu0 %v784_v27, %s1356_s9  ;;  %s1364_s9 = smov 73  }
 0x10e   :  { %v468_v31 = vpop.permute.xlu1 %467  ;;  %805 = vrot.lane.b32.xlu2 %v800_v29, %s1357_s13  ;;  %s1365_s13 = smov 72  }
 0x10f   :  { %v454_v32 = vpop.permute.xlu0 %453  ;;  %v472_v33 = vsel %vm471_vm11, %v468_v31, %v470_v3  ;;  %vm551_vm11 = vcmask 785408  }
 0x110   :  { %v456_v34 = vsel %vm455_vm12, %v1587_v53, %v454_v32  ;;  %v460_v35 = vadd.f32 %v454_v32, %v444_v22  ;;  %v1617_v39 = vpop.permute.xlu2 %547  ;;  %v848_v53 = vmul.f32 %v1631_v50, %v846_v6  ;;  %v912_v22 = vmul.f32 %v1631_v50, %v910_v16 }
 0x111   :  { %v459_v37 = vadd.f32 %v456_v34, %v443_v26  ;;  %v926_v26 = vstv %s1650_s30  ;;  %vm583_vm12 = vcmask 769024  }
 0x112   :  { %v476_v40 = vadd.f32 %v470_v3, %v460_v35  ;;  %v927_v29 = vmul.f32 %v1623_v43, %v926_v26  ;;  %v943_v35 = vmul.f32 %v1623_v43, %v942_v30 }
 0x113   :  { %v475_v42 = vadd.f32 %v472_v33, %v459_v37  ;;  %v928_v37 = vmul.f32 %v1631_v50, %v926_v26 }
 0x114   :  { %821 = vrot.lane.b32.xlu1 %v816_v36, %s1358_s19 }
 0x115   :  { %819 = vrot.lane.b32.xlu0 %v815_v38, %s1358_s19  ;;  %v944_v38 = vmul.f32 %v1631_v50, %v942_v30  ;;  %s1368_s19 = smov 69  }
 0x116   :  { %v486_v45 = vpop.permute.xlu1 %485  ;;  %835 = vrot.lane.b32.xlu2 %v831_v44, %s1359_s21 }
 0x117   :  { %v492_v0 = vadd.f32 %v486_v45, %v476_v40  ;;  %v484_v46 = vpop.permute.xlu0 %483 }
 0x118   :  { %v488_v47 = vsel %vm487_vm13, %v484_v46, %v486_v45  ;;  %v566_v52 = vpop.permute.xlu2 %565  ;;  %vm615_vm13 = vcmask 752640  }
 0x119   :  { %v491_v49 = vadd.f32 %v488_v47, %v475_v42 }
 0x11c   :  { %851 = vrot.lane.b32.xlu1 %v847_v48, %s1360_s24 }
 0x11d   :  { %837 = vrot.lane.b32.xlu0 %v832_v51, %s1359_s21  ;;  %s1676_s21 = sld [smem:[#allocation4 + $0x3]] }
 0x11e   :  { %v516_v55 = vpop.permute.xlu1 %515  ;;  %853 = vrot.lane.b32.xlu2 %v848_v53, %s1360_s24  ;;  %s1689_s24 = sld [smem:[#allocation4 + $0x4]] }
 0x11f   :  { %v502_v56 = vpop.permute.xlu0 %501  ;;  %v520_v57 = vsel %vm519_vm14, %v516_v55, %v518_v28  ;;  %vm599_vm14 = vcmask 760832  }
 0x120   :  { %v504_v58 = vsel %vm503_vm15, %v1602_v15, %v502_v56  ;;  %v508_v59 = vadd.f32 %v502_v56, %v492_v0  ;;  %v1643_v63 = vpop.permute.xlu2 %595  ;;  %v896_v15 = vmul.f32 %v1631_v50, %v894_v5 }
 0x121   :  { %v507_v61 = vadd.f32 %v504_v58, %v491_v49  ;;  %v974_v49 = vstv %s1663_s16 }
 0x122   :  { %v524_v1 = vadd.f32 %v518_v28, %v508_v59  ;;  %v976_v59 = vmul.f32 %v1631_v50, %v974_v49 }
 0x123   :  { %v523_v3 = vadd.f32 %v520_v57, %v507_v61 }
 0x124   :  { %869 = vrot.lane.b32.xlu1 %v864_v60, %s1361_s2 }
 0x125   :  { %867 = vrot.lane.b32.xlu0 %v863_v62, %s1361_s2  ;;  %s1214_s2 = sld [smem:[#allocation4 + $0x8]] }
 0x126   :  { %v534_v7 = vpop.permute.xlu1 %533  ;;  %883 = vrot.lane.b32.xlu2 %v879_v4, %s1362_s29 }
 0x127   :  { %v540_v8 = vadd.f32 %v534_v7, %v524_v1  ;;  %v532_v9 = vpop.permute.xlu0 %531 }
 0x128   :  { %v536_v10 = vsel %vm535_vm9, %v532_v9, %v534_v7  ;;  %v614_v14 = vpop.permute.xlu2 %613  ;;  %vm631_vm9 = vcmask 744448  }
 0x129   :  { %v539_v12 = vadd.f32 %v536_v10, %v523_v3 }
 0x12c   :  { %899 = vrot.lane.b32.xlu1 %v895_v11, %s1363_s5 }
 0x12d   :  { %885 = vrot.lane.b32.xlu0 %v880_v13, %s1362_s29 }
 0x12e   :  { %v564_v17 = vpop.permute.xlu1 %563  ;;  %901 = vrot.lane.b32.xlu2 %v896_v15, %s1363_s5 }
 0x12f   :  { %v550_v18 = vpop.permute.xlu0 %549  ;;  %v568_v19 = vsel %vm567_vm10, %v564_v17, %v566_v52  ;;  %vm663_vm10 = vcmask 728064  }
 0x130   :  { %v552_v20 = vsel %vm551_vm11, %v1617_v39, %v550_v18  ;;  %v556_v21 = vadd.f32 %v550_v18, %v540_v8  ;;  %v644_v28 = vpop.permute.xlu2 %643  ;;  %v958_v39 = vstv %s1205_s11  ;;  %vm647_vm11 = vcmask 736256  }
 0x131   :  { %v555_v23 = vadd.f32 %v552_v20, %v539_v12  ;;  %v960_v0 = vmul.f32 %v1631_v50, %v958_v39  ;;  %v959_v47 = vmul.f32 %v1623_v43, %v958_v39 }
 0x132   :  { %v572_v25 = vadd.f32 %v566_v52, %v556_v21  ;;  %v975_v52 = vmul.f32 %v1623_v43, %v974_v49 }
 0x133   :  { %v571_v27 = vadd.f32 %v568_v19, %v555_v23 }
 0x134   :  { %917 = vrot.lane.b32.xlu1 %v912_v22, %s1364_s9 }
 0x135   :  { %915 = vrot.lane.b32.xlu0 %v911_v24, %s1364_s9 }
 0x136   :  { %v582_v31 = vpop.permute.xlu1 %581  ;;  %931 = vrot.lane.b32.xlu2 %v927_v29, %s1365_s13 }
 0x137   :  { %v588_v32 = vadd.f32 %v582_v31, %v572_v25  ;;  %v580_v33 = vpop.permute.xlu0 %579 }
 0x138   :  { %v584_v34 = vsel %vm583_vm12, %v580_v33, %v582_v31  ;;  %v662_v40 = vpop.permute.xlu2 %661  ;;  %vm679_vm12 = vcmask 719872  }
 0x139   :  { %v587_v36 = vadd.f32 %v584_v34, %v571_v27 }
 0x13c   :  { %947 = vrot.lane.b32.xlu1 %v943_v35, %s1366_s17 }
 0x13d   :  { %933 = vrot.lane.b32.xlu0 %v928_v37, %s1365_s13 }
 0x13e   :  { %v612_v41 = vpop.permute.xlu1 %611  ;;  %949 = vrot.lane.b32.xlu2 %v944_v38, %s1366_s17 }
 0x13f   :  { %v598_v42 = vpop.permute.xlu0 %597  ;;  %v616_v44 = vsel %vm615_vm13, %v612_v41, %v614_v14  ;;  %vm695_vm13 = vcmask 711680  }
 0x140   :  { %v600_v6 = vsel %vm599_vm14, %v1643_v63, %v598_v42  ;;  %v604_v45 = vadd.f32 %v598_v42, %v588_v32  ;;  %v692_v56 = vpop.permute.xlu2 %691  ;;  %vm711_vm14 = vcmask 703488  }
 0x141   :  { %v603_v46 = vadd.f32 %v600_v6, %v587_v36 }
 0x142   :  { %v620_v48 = vadd.f32 %v614_v14, %v604_v45 }
 0x143   :  { %v619_v51 = vadd.f32 %v616_v44, %v603_v46 }
 0x144   :  { %965 = vrot.lane.b32.xlu1 %v960_v0, %s1367_s18 }
 0x145   :  { %963 = vrot.lane.b32.xlu0 %v959_v47, %s1367_s18 }
 0x146   :  { %v630_v53 = vpop.permute.xlu1 %629  ;;  %979 = vrot.lane.b32.xlu2 %v975_v52, %s1368_s19 }
 0x147   :  { %v636_v54 = vadd.f32 %v630_v53, %v620_v48  ;;  %v628_v55 = vpop.permute.xlu0 %627 }
 0x148   :  { %v632_v57 = vsel %vm631_vm9, %v628_v55, %v630_v53  ;;  %v710_v3 = vpop.permute.xlu2 %709  ;;  %vm727_vm9 = vcmask 695296  }
 0x149   :  { %v635_v58 = vadd.f32 %v632_v57, %v619_v51 }
 0x14d   :  { %981 = vrot.lane.b32.xlu0 %v976_v59, %s1368_s19 }
 0x14e   :  { %v660_v60 = vpop.permute.xlu1 %659 }
 0x14f   :  { %v646_v61 = vpop.permute.xlu0 %645  ;;  %v664_v62 = vsel %vm663_vm10, %v660_v60, %v662_v40  ;;  %vm743_vm10 = vcmask 687104  }
 0x150   :  { %v648_v63 = vsel %vm647_vm11, %v644_v28, %v646_v61  ;;  %v652_v1 = vadd.f32 %v646_v61, %v636_v54  ;;  %v740_v11 = vpop.permute.xlu2 %739  ;;  %vm759_vm11 = vcmask 678912  }
 0x151   :  { %v651_v2 = vadd.f32 %v648_v63, %v635_v58 }
 0x152   :  { %v668_v4 = vadd.f32 %v662_v40, %v652_v1 }
 0x153   :  { %v667_v5 = vadd.f32 %v664_v62, %v651_v2 }
 0x156   :  { %v678_v7 = vpop.permute.xlu1 %677 }
 0x157   :  { %v676_v8 = vpop.permute.xlu0 %675  ;;  %v684_v29 = vadd.f32 %v678_v7, %v668_v4 }
 0x158   :  { %v680_v9 = vsel %vm679_vm12, %v676_v8, %v678_v7  ;;  %v758_v14 = vpop.permute.xlu2 %757  ;;  %vm775_vm12 = vcmask 670720  }
 0x159   :  { %v683_v10 = vadd.f32 %v680_v9, %v667_v5 }
 0x15e   :  { %v708_v12 = vpop.permute.xlu1 %707 }
 0x15f   :  { %v694_v13 = vpop.permute.xlu0 %693  ;;  %v712_v35 = vsel %vm711_vm14, %v708_v12, %v710_v3  ;;  %vm807_vm14 = vcmask 654336  }
 0x160   :  { %v788_v19 = vpop.permute.xlu2 %787  ;;  %v696_v30 = vsel %vm695_vm13, %v692_v56, %v694_v13  ;;  %v700_v33 = vadd.f32 %v694_v13, %v684_v29  ;;  %vm791_vm13 = vcmask 662528  }
 0x161   :  { %v699_v34 = vadd.f32 %v696_v30, %v683_v10 }
 0x162   :  { %v716_v36 = vadd.f32 %v710_v3, %v700_v33 }
 0x163   :  { %v715_v38 = vadd.f32 %v712_v35, %v699_v34 }
 0x166   :  { %v726_v15 = vpop.permute.xlu1 %725 }
 0x167   :  { %v724_v16 = vpop.permute.xlu0 %723  ;;  %v732_v39 = vadd.f32 %v726_v15, %v716_v36 }
 0x168   :  { %v806_v22 = vpop.permute.xlu2 %805  ;;  %v728_v37 = vsel %vm727_vm9, %v724_v16, %v726_v15  ;;  %vm823_vm9 = vcmask 646144  }
 0x169   :  { %v731_v42 = vadd.f32 %v728_v37, %v715_v38 }
 0x16e   :  { %v756_v17 = vpop.permute.xlu1 %755 }
 0x16f   :  { %v742_v18 = vpop.permute.xlu0 %741  ;;  %v760_v46 = vsel %vm759_vm11, %v756_v17, %v758_v14  ;;  %vm855_vm11 = vcmask 629760  }
 0x170   :  { %v836_v25 = vpop.permute.xlu2 %835  ;;  %v744_v40 = vsel %vm743_vm10, %v740_v11, %v742_v18  ;;  %v748_v45 = vadd.f32 %v742_v18, %v732_v39  ;;  %vm839_vm10 = vcmask 637952  }
 0x171   :  { %v747_v0 = vadd.f32 %v744_v40, %v731_v42 }
 0x172   :  { %v764_v47 = vadd.f32 %v758_v14, %v748_v45 }
 0x173   :  { %v763_v49 = vadd.f32 %v760_v46, %v747_v0 }
 0x176   :  { %v774_v20 = vpop.permute.xlu1 %773 }
 0x177   :  { %v772_v21 = vpop.permute.xlu0 %771  ;;  %v780_v51 = vadd.f32 %v774_v20, %v764_v47  ;;  %v989_v47 = vlaneseq }
 0x178   :  { %v854_v28 = vpop.permute.xlu2 %853  ;;  %v776_v48 = vsel %vm775_vm12, %v772_v21, %v774_v20  ;;  %vm871_vm12 = vcmask 621568  }
 0x179   :  { %v779_v54 = vadd.f32 %v776_v48, %v763_v49  ;;  %v990_v48 = vand.u32 127, %v989_v47 }
 0x17b   :  { %v991_v49 = vadd.s32 128, %v990_v48 }
 0x17e   :  { %v804_v23 = vpop.permute.xlu1 %803 }
 0x17f   :  { %v790_v24 = vpop.permute.xlu0 %789  ;;  %v808_v59 = vsel %vm807_vm14, %v804_v23, %v806_v22  ;;  %vm903_vm14 = vcmask 605184  }
 0x180   :  { %v884_v6 = vpop.permute.xlu2 %883  ;;  %v792_v52 = vsel %vm791_vm13, %v788_v19, %v790_v24  ;;  %v796_v56 = vadd.f32 %v790_v24, %v780_v51  ;;  %vm887_vm13 = vcmask 613376   ;;  %v1025_v51 = vstv %s1680_s0 }
 0x181   :  { %v795_v57 = vadd.f32 %v792_v52, %v779_v54 }
 0x182   :  { %v812_v60 = vadd.f32 %v806_v22, %v796_v56 }
 0x183   :  { %v811_v62 = vadd.f32 %v808_v59, %v795_v57  ;;  %v1090_v57 = vstv %s1682_s23  ;;  %v1064_v59 = vstv %s1689_s24 }
 0x186   :  { %v822_v26 = vpop.permute.xlu1 %821 }
 0x187   :  { %v820_v27 = vpop.permute.xlu0 %819  ;;  %v828_v63 = vadd.f32 %v822_v26, %v812_v60 }
 0x188   :  { %v902_v58 = vpop.permute.xlu2 %901  ;;  %v824_v61 = vsel %vm823_vm9, %v820_v27, %v822_v26  ;;  %vm919_vm9 = vcmask 596992  }
 0x189   :  { %v827_v3 = vadd.f32 %v824_v61, %v811_v62 }
 0x18e   :  { %v852_v31 = vpop.permute.xlu1 %851 }
 0x18f   :  { %v838_v32 = vpop.permute.xlu0 %837  ;;  %v856_v8 = vsel %vm855_vm11, %v852_v31, %v854_v28  ;;  %vm951_vm11 = vcmask 580608  }
 0x190   :  { %v840_v1 = vsel %vm839_vm10, %v836_v25, %v838_v32  ;;  %v844_v5 = vadd.f32 %v838_v32, %v828_v63  ;;  %v932_v9 = vpop.permute.xlu2 %931  ;;  %vm935_vm10 = vcmask 588800  }
 0x191   :  { %v843_v7 = vadd.f32 %v840_v1, %v827_v3  ;;  %v1103_v3 = vstv %s1213_s25 }
 0x192   :  { %v860_v10 = vadd.f32 %v854_v28, %v844_v5 }
 0x193   :  { %v859_v12 = vadd.f32 %v856_v8, %v843_v7 }
 0x196   :  { %v870_v41 = vpop.permute.xlu1 %869 }
 0x197   :  { %v868_v44 = vpop.permute.xlu0 %867  ;;  %v876_v13 = vadd.f32 %v870_v41, %v860_v10 }
 0x198   :  { %v872_v11 = vsel %vm871_vm12, %v868_v44, %v870_v41  ;;  %v950_v24 = vpop.permute.xlu2 %949  ;;  %vm967_vm12 = vcmask 572416  }
 0x199   :  { %v875_v15 = vadd.f32 %v872_v11, %v859_v12  ;;  %v1116_v11 = vstv %s1214_s2 }
 0x19e   :  { %v900_v53 = vpop.permute.xlu1 %899 }
 0x19f   :  { %v886_v55 = vpop.permute.xlu0 %885  ;;  %v904_v20 = vsel %vm903_vm14, %v900_v53, %v902_v58  ;;  %vm1004_vm14 = vcmask 236544  }
 0x1a0   :  { %v888_v14 = vsel %vm887_vm13, %v884_v6, %v886_v55  ;;  %v892_v18 = vadd.f32 %v886_v55, %v876_v13  ;;  %v980_v36 = vpop.permute.xlu2 %979  ;;  %vm983_vm13 = vcmask 564224  }
 0x1a1   :  { %v891_v19 = vadd.f32 %v888_v14, %v875_v15  ;;  %v1129_v15 = vstv %s1215_s27 }
 0x1a2   :  { %v908_v21 = vadd.f32 %v902_v58, %v892_v18 }
 0x1a3   :  { %v907_v23 = vadd.f32 %v904_v20, %v891_v19 }
 0x1a6   :  { %v918_v2 = vpop.permute.xlu1 %917 }
 0x1a7   :  { %v916_v4 = vpop.permute.xlu0 %915  ;;  %v924_v25 = vadd.f32 %v918_v2, %v908_v21 }
 0x1a8   :  { %v920_v22 = vsel %vm919_vm9, %v916_v4, %v918_v2  ;;  %vm995_vm9 = vcmp.lt.s32.totalorder %v991_v49, 132 }
 0x1a9   :  { %v923_v27 = vadd.f32 %v920_v22, %v907_v23 }
 0x1ae   :  { %v948_v16 = vpop.permute.xlu1 %947 }
 0x1af   :  { %v934_v17 = vpop.permute.xlu0 %933  ;;  %v952_v32 = vsel %vm951_vm11, %v948_v16, %v950_v24 }
 0x1b0   :  { %v936_v26 = vsel %vm935_vm10, %v932_v9, %v934_v17  ;;  %v940_v29 = vadd.f32 %v934_v17, %v924_v25  ;;  %vm992_vm10 = vcmp.ge.s32.totalorder %v990_v48, 4 }
 0x1b1   :  { %v939_v30 = vadd.f32 %v936_v26, %v923_v27 }
 0x1b2   :  { %v956_v33 = vadd.f32 %v950_v24, %v940_v29 }
 0x1b3   :  { %v955_v35 = vadd.f32 %v952_v32, %v939_v30 }
 0x1b6   :  { %v966_v31 = vpop.permute.xlu1 %965 }
 0x1b7   :  { %v964_v28 = vpop.permute.xlu0 %963  ;;  %v972_v37 = vadd.f32 %v966_v31, %v956_v33 }
 0x1b8   :  { %v968_v34 = vsel %vm967_vm12, %v964_v28, %v966_v31 }
 0x1b9   :  { %v971_v38 = vadd.f32 %v968_v34, %v955_v35 }
 0x1bf   :  { %v982_v39 = vpop.permute.xlu0 %981 }
 0x1c0   :  { %v984_v40 = vsel %vm983_vm13, %v980_v36, %v982_v39  ;;  %v988_v41 = vadd.f32 %v982_v39, %v972_v37 }
 0x1c1   :  { %v987_v42 = vadd.f32 %v984_v40, %v971_v38 }
 0x1c2   :  { %1002 = vrot.lane.b32.xlu2 %v988_v41, %s1369_s20 }
 0x1c3   :  { %1000 = vrot.lane.b32.xlu1 %v987_v42, %s1369_s20 }
 0x21c   :  { %v1003_v44 = vpop.permute.xlu2 %1002 }
 0x235   :  { %v1001_v6 = vpop.permute.xlu1 %1000 }
 0x236   :  { %v1005_v45 = vsel %vm1004_vm14, %v1001_v6, %v1003_v44  ;;  %v1008_v0 = vsub.f32 %v1623_v43, %v1001_v6  ;;  %v1051_v43 = vstv %s1676_s21 }
 0x237   :  { %v1009_v46 = vsub.f32 %v1631_v50, %v1005_v45  ;;  %v1038_v50 = vstv %s1678_s22 }
 0x238   :  { %1012 = vrot.lane.b32.xlu0 %v1008_v0, %s1338_s15 }
 0x239   :  { %1014 = vrot.lane.b32.xlu1 %v1009_v46, %s1338_s15  ;;  %s1687_s15 = sld [smem:[#allocation4 + $0x5]] }
 0x23f   :  { %v1077_v58 = vstv %s1687_s15 }
 0x2aa   :  { %v1013_v60 = vpop.permute.xlu0 %1012 }
 0x2ab   :  { %v1015_v52 = vpop.permute.xlu1 %1014 }
 0x2ac   :  { %v1020_v53 = vsel %vm995_vm9, %v1015_v52, 0.0  ;;  %v1016_v1 = vsel %vm503_vm15, %v1013_v60, %v1015_v52 }
 0x2ad   :  { %v1053_v54 = vmul.f32 %v1051_v43, %v1020_v53  ;;  %v1040_v55 = vmul.f32 %v1038_v50, %v1020_v53  ;;  %v1027_v56 = vmul.f32 %v1025_v51, %v1020_v53  ;;  %v1092_v61 = vmul.f32 %v1090_v57, %v1020_v53 }
 0x2ae   :  { %v1079_v62 = vmul.f32 %v1077_v58, %v1020_v53  ;;  %v1066_v63 = vmul.f32 %v1064_v59, %v1020_v53  ;;  %v1019_v2 = vsel %vm992_vm10, %v1016_v1, 0.0  ;;  %v1105_v7 = vmul.f32 %v1103_v3, %v1020_v53 }
 0x2af   :  { %1058 = vrot.lane.b32.xlu1 %v1053_v54, %s1312_s28  ;;  %1045 = vrot.lane.b32.xlu2 %v1040_v55, %s1310_s1  ;;  %v1039_v4 = vmul.f32 %v1038_v50, %v1019_v2  ;;  %v1026_v5 = vmul.f32 %v1025_v51, %v1019_v2  ;;  %v1078_v8 = vmul.f32 %v1077_v58, %v1019_v2 }
 0x2b0   :  { %1032 = vrot.lane.b32.xlu0 %v1027_v56, %s1311_s26  ;;  %v1065_v9 = vmul.f32 %v1064_v59, %v1019_v2  ;;  %v1052_v10 = vmul.f32 %v1051_v43, %v1019_v2  ;;  %v1117_v12 = vmul.f32 %v1116_v11, %v1019_v2  ;;  %v1104_v13 = vmul.f32 %v1103_v3, %v1019_v2 }
 0x2b1   :  { %v1091_v14 = vmul.f32 %v1090_v57, %v1019_v2  ;;  %v1131_v16 = vmul.f32 %v1129_v15, %v1020_v53  ;;  %v1118_v17 = vmul.f32 %v1116_v11, %v1020_v53  ;;  %v1130_v18 = vmul.f32 %v1129_v15, %v1019_v2 }
 0x2b7   :  { %1097 = vrot.lane.b32.xlu1 %v1092_v61, %s1315_s8  ;;  %1084 = vrot.lane.b32.xlu2 %v1079_v62, %s1314_s6 }
 0x2b8   :  { %1071 = vrot.lane.b32.xlu0 %v1066_v63, %s1313_s4 }
 0x2bf   :  { %1043 = vrot.lane.b32.xlu1 %v1039_v4, %s1310_s1  ;;  %1030 = vrot.lane.b32.xlu2 %v1026_v5, %s1311_s26  ;;  %s1021_s1 = sld [smem:[#allocation4]] }
 0x2c0   :  { %1110 = vrot.lane.b32.xlu0 %v1105_v7, %s1316_s10 }
 0x2c5   :  { %v1022_v28 = vstv %s1021_s1 }
 0x2c6   :  { %v1023_v31 = vmul.f32 %v1022_v28, %v1019_v2 }
 0x2c7   :  { %1082 = vrot.lane.b32.xlu1 %v1078_v8, %s1314_s6  ;;  %1069 = vrot.lane.b32.xlu2 %v1065_v9, %s1313_s4 }
 0x2c8   :  { %1056 = vrot.lane.b32.xlu0 %v1052_v10, %s1312_s28 }
 0x2cf   :  { %1121 = vrot.lane.b32.xlu1 %v1117_v12, %s1317_s12  ;;  %1108 = vrot.lane.b32.xlu2 %v1104_v13, %s1316_s10 }
 0x2d0   :  { %1095 = vrot.lane.b32.xlu0 %v1091_v14, %s1315_s8 }
 0x2d7   :  { %1136 = vrot.lane.b32.xlu1 %v1131_v16, %s1318_s14  ;;  %1123 = vrot.lane.b32.xlu2 %v1118_v17, %s1317_s12 }
 0x2d8   :  { %1134 = vrot.lane.b32.xlu0 %v1130_v18, %s1318_s14 }
 0x309   :  { %v1046_v19 = vpop.permute.xlu2 %1045 }
 0x311   :  { %v1085_v20 = vpop.permute.xlu2 %1084 }
 0x319   :  { %v1031_v24 = vpop.permute.xlu2 %1030 }
 0x321   :  { %v1059_v21 = vpop.permute.xlu1 %1058  ;;  %v1070_v29 = vpop.permute.xlu2 %1069 }
 0x322   :  { %v1033_v22 = vpop.permute.xlu0 %1032 }
 0x323   :  { %v1034_v30 = vsel %vm55_vm2, %v1031_v24, %v1033_v22 }
 0x324   :  { %v1036_v33 = vadd.f32 %v1034_v30, %v1023_v31 }
 0x329   :  { %v1098_v23 = vpop.permute.xlu1 %1097  ;;  %v1109_v40 = vpop.permute.xlu2 %1108 }
 0x32a   :  { %v1072_v25 = vpop.permute.xlu0 %1071 }
 0x32b   :  { %v1073_v39 = vsel %vm103_vm3, %v1070_v29, %v1072_v25 }
 0x331   :  { %v1044_v26 = vpop.permute.xlu1 %1043  ;;  %v1124_v49 = vpop.permute.xlu2 %1123 }
 0x332   :  { %v1111_v27 = vpop.permute.xlu0 %1110  ;;  %v1047_v32 = vsel %vm71_vm1, %v1044_v26, %v1046_v19 }
 0x333   :  { %v1049_v35 = vadd.f32 %v1047_v32, %v1036_v33  ;;  %v1112_v47 = vsel %vm151_vm6, %v1109_v40, %v1111_v27 }
 0x339   :  { %v1083_v34 = vpop.permute.xlu1 %1082 }
 0x33a   :  { %v1057_v36 = vpop.permute.xlu0 %1056  ;;  %v1086_v42 = vsel %vm119_vm5, %v1083_v34, %v1085_v20 }
 0x33b   :  { %v1060_v37 = vsel %vm87_vm0, %v1057_v36, %v1059_v21 }
 0x33c   :  { %v1062_v38 = vadd.f32 %v1060_v37, %v1049_v35 }
 0x33e   :  { %v1075_v41 = vadd.f32 %v1073_v39, %v1062_v38 }
 0x340   :  { %v1088_v6 = vadd.f32 %v1086_v42, %v1075_v41 }
 0x341   :  { %v1122_v44 = vpop.permute.xlu1 %1121 }
 0x342   :  { %v1096_v45 = vpop.permute.xlu0 %1095  ;;  %v1125_v43 = vsel %vm167_vm8, %v1122_v44, %v1124_v49 }
 0x343   :  { %v1099_v0 = vsel %vm135_vm4, %v1096_v45, %v1098_v23 }
 0x344   :  { %v1101_v46 = vadd.f32 %v1099_v0, %v1088_v6 }
 0x346   :  { %v1114_v48 = vadd.f32 %v1112_v47, %v1101_v46 }
 0x348   :  { %v1127_v51 = vadd.f32 %v1125_v43, %v1114_v48 }
 0x349   :  { %v1137_v50 = vpop.permute.xlu1 %1136 }
 0x34a   :  { %v1135_v52 = vpop.permute.xlu0 %1134 }
 0x34b   :  { %v1138_v53 = vsel %vm183_vm7, %v1135_v52, %v1137_v50 }
 0x34c   :  { %v1140_v54 = vadd.f32 %v1138_v53, %v1127_v51 }
 0x34e   :  { %1141 = vst [vmem:[%s1728_s3] sm:$0xff] %v1140_v54 }
 0x34f   :  { %1146 = vsyncpa [#allocation3], 1 }
 0x350   :  { %1147 = vsyncpa [#allocation5], 1 }

</bundles_post_ra>
